<compile_context>
chip_gen: v7x
topology: tpu7x:2x2x1
jax: 0.10.0
libtpu: 0.0.40
codegen_flags: <defaults>
</compile_context>

<pallas_src>
import jax
import jax.numpy as jnp
from jax.experimental import pallas as pl
from jax.experimental.pallas import tpu as pltpu


def _round_up(x, m):
    return ((x + m - 1) // m) * m


def make_kernel(TB, CB, LP, L_valid, Vp, Cp, NC):
    """Kernel for one grid step: TB batch elements, processed CB at a time."""
    n_chunks = TB // CB
    M = CB * LP                      # conv rows per chunk (multiple of 128)
    unroll = 4 if n_chunks % 4 == 0 else 2 if n_chunks % 2 == 0 else 1

    def kernel(ids_ref, w0_ref, w1_ref, w2_ref, wf_ref, bf_ref, o_ref):
        # ids_ref : (TB, LP+2) int32  token ids (positions >= L hold pad id 0)
        # wk_ref  : (Vp, Cp)   bf16   folded embed@conv weight for tap k
        #                             (tap 0 also carries the conv bias)
        # wf_ref  : (Cp, NCp)  f32    lane-padded fc weight
        # bf_ref  : (1, NCp)   f32    lane-padded fc bias
        # o_ref   : (TB, NC)   f32    logits

        def chunk(c, carry):
            r0 = pl.multiple_of(c * CB, CB)
            ids_c = ids_ref[pl.ds(r0, CB), :]                          # (CB, LP+2)
            lane = jax.lax.broadcasted_iota(jnp.int32, (CB, LP, Vp), 2)

            def onehot(k):
                # One-hot of the token at conv-tap offset k, laid out as MXU LHS rows.
                ids_k = ids_c[:, k:k + LP]                             # (CB, LP)
                oh = (lane == ids_k[:, :, None]).astype(jnp.bfloat16)  # (CB, LP, Vp)
                return oh.reshape(M, Vp)                               # tile-aligned collapse

            # Gather + conv fused: conv[row, c] = sum_k Wk[token_{t+k}, c] (+bias via W0).
            acc = jnp.dot(onehot(0), w0_ref[...], preferred_element_type=jnp.float32)
            acc = acc + jnp.dot(onehot(1), w1_ref[...], preferred_element_type=jnp.float32)
            acc = acc + jnp.dot(onehot(2), w2_ref[...], preferred_element_type=jnp.float32)

            conv = jnp.maximum(acc, 0.0).reshape(CB, LP, Cp)           # ReLU
            # MaxPool1d(2) followed by global max == max over the first L_valid rows
            # (static slice: padded rows and the odd pool tail are excluded, no mask).
            g = jnp.max(conv[:, :L_valid, :], axis=1)                  # (CB, Cp) f32

            logits = jnp.dot(g, wf_ref[...], preferred_element_type=jnp.float32)
            logits = logits + bf_ref[...]                              # (CB, NCp)
            o_ref[pl.ds(r0, CB), :] = logits[:, :NC].astype(o_ref.dtype)
            return carry

        jax.lax.fori_loop(0, n_chunks, chunk, 0, unroll=unroll)

    return kernel


def convolution_model_forward(x_tokens, embed_table, w_conv, b_conv, w_fc, b_fc,
                              tb_max=512):
    """x_tokens: (B, L) int token ids. Returns (B, num_classes) float32 logits."""
    B, L = x_tokens.shape
    V, E = embed_table.shape
    K, E2, C = w_conv.shape
    assert K == 3 and E2 == E
    C2, NC = w_fc.shape
    assert C2 == C
    assert L >= 4, "conv1d(k=3) + maxpool(2) requires sequence length >= 4"
    assert tb_max >= 16

    L_out = L - 2                         # conv output length
    L_valid = 2 * (L_out // 2)            # conv rows surviving MaxPool1d(2)
    LP = _round_up(L_out, 16)             # conv rows per element (bf16-tile aligned)
    LPI = LP + 2                          # token positions needed per element
    Vp = _round_up(V, 128)                # lane-padded vocab (one-hot K dim)
    Cp = _round_up(C, 128)                # lane-padded conv channels
    NCp = _round_up(NC, 128)              # lane-padded classes (fc matmul only)

    CB = 8                                # in-kernel chunk size (batch elems / loop iter)
    TB = min(tb_max, _round_up(B, 16))    # batch tile per grid step
    if _round_up(B, TB) // TB < 2 and TB >= 32:
        TB = _round_up(TB // 2, 16)       # guarantee >=2 grid steps for v7x megacore
    B_pad = _round_up(B, TB)

    # Streamed operand: int32 ids only (~LPI*4 bytes / element). Padded positions use
    # token 0; their conv rows are dropped by the static :L_valid slice in the kernel.
    ids = jnp.pad(x_tokens.astype(jnp.int32), ((0, B_pad - B), (0, LPI - L)))

    # Fold the embedding table into the three conv taps (exact: the lookup is linear in
    # the one-hot encoding), and fold the conv bias into tap 0 (one-hot rows sum to 1).
    # Only these folded weights are bf16-rounded; everything else stays f32.
    hi = jax.lax.Precision.HIGHEST
    f32 = jnp.float32
    tbl = jnp.pad(embed_table.astype(f32), ((0, Vp - V), (0, 0)))             # (Vp, E)
    pad_c = ((0, 0), (0, Cp - C))
    w0 = jnp.pad(jnp.dot(tbl, w_conv[0].astype(f32), precision=hi)
                 + b_conv.astype(f32)[None, :], pad_c).astype(jnp.bfloat16)   # (Vp, Cp)
    w1 = jnp.pad(jnp.dot(tbl, w_conv[1].astype(f32), precision=hi),
                 pad_c).astype(jnp.bfloat16)
    w2 = jnp.pad(jnp.dot(tbl, w_conv[2].astype(f32), precision=hi),
                 pad_c).astype(jnp.bfloat16)
    wf = jnp.pad(w_fc.astype(f32), ((0, Cp - C), (0, NCp - NC)))              # (Cp, NCp)
    bf = jnp.pad(b_fc.astype(f32), (0, NCp - NC)).reshape(1, NCp)             # (1, NCp)

    out = pl.pallas_call(
        make_kernel(TB, CB, LP, L_valid, Vp, Cp, NC),
        out_shape=jax.ShapeDtypeStruct((B_pad, NC), jnp.float32),
        grid_spec=pltpu.PrefetchScalarGridSpec(
            num_scalar_prefetch=0,
            grid=(B_pad // TB,),
            in_specs=[
                pl.BlockSpec((TB, LPI), lambda i: (i, 0)),   # token ids (streamed)
                pl.BlockSpec((Vp, Cp), lambda i: (0, 0)),    # folded tap-0 weight (+bias)
                pl.BlockSpec((Vp, Cp), lambda i: (0, 0)),    # folded tap-1 weight
                pl.BlockSpec((Vp, Cp), lambda i: (0, 0)),    # folded tap-2 weight
                pl.BlockSpec((Cp, NCp), lambda i: (0, 0)),   # fc weight (grid-invariant)
                pl.BlockSpec((1, NCp), lambda i: (0, 0)),    # fc bias
            ],
            out_specs=pl.BlockSpec((TB, NC), lambda i: (i, 0)),
        ),
        compiler_params=pltpu.CompilerParams(
            dimension_semantics=("parallel",),
            vmem_limit_bytes=32 * 1024 * 1024,
        ),
    )(ids, w0, w1, w2, wf, bf)

    return out[:B]


def reference_forward(x_tokens, embed_table, w_conv, b_conv, w_fc, b_fc):
    """Pure-JAX reference matching PyTorch forward semantics. It mirrors the kernel's
    only precision deviation: the folded (embed_table @ w_conv[k]) weights (+ conv
    bias on tap 0) are rounded to bf16 once; everything else is f32."""
    hi = jax.lax.Precision.HIGHEST
    f32 = jnp.float32
    tbl = embed_table.astype(f32)
    w0 = (jnp.dot(tbl, w_conv[0].astype(f32), precision=hi)
          + b_conv.astype(f32)[None, :]).astype(jnp.bfloat16).astype(f32)
    w1 = jnp.dot(tbl, w_conv[1].astype(f32), precision=hi).astype(jnp.bfloat16).astype(f32)
    w2 = jnp.dot(tbl, w_conv[2].astype(f32), precision=hi).astype(jnp.bfloat16).astype(f32)

    B, L = x_tokens.shape
    L_out = L - 2
    conv = (w0[x_tokens[:, 0:L_out]]
            + w1[x_tokens[:, 1:L_out + 1]]
            + w2[x_tokens[:, 2:L_out + 2]])                   # (B, L_out, C)
    conv = jnp.maximum(conv, 0.0)
    L_valid = 2 * (L_out // 2)
    g = jnp.max(conv[:, :L_valid, :], axis=1)                 # (B, C)
    return jnp.dot(g, w_fc.astype(f32), precision=hi) + b_fc.astype(f32)[None, :]


if __name__ == "__main__":
    # Small, module-consistent shapes.
    B, L = 2, 16
    vocab_size = 100
    embedding_dim = 32
    conv_dim = 64
    num_classes = 8

    key = jax.random.PRNGKey(0)
    k_tok, k_emb, k_wc, k_bc, k_wf, k_bf = jax.random.split(key, 6)

    x_tokens = jax.random.randint(k_tok, (B, L), 0, vocab_size, dtype=jnp.int32)

    # Deterministic synthetic parameters (shapes follow nn.Module __init__).
    embed_table = jax.random.normal(k_emb, (vocab_size, embedding_dim), jnp.float32)
    # PyTorch Conv1d weight is (C_out, C_in, K); stored transposed as (K, E, C).
    w_conv = 0.1 * jax.random.normal(k_wc, (3, embedding_dim, conv_dim), jnp.float32)
    b_conv = 0.1 * jax.random.normal(k_bc, (conv_dim,), jnp.float32)
    # PyTorch Linear weight is (NC, C); stored transposed as (C, NC).
    w_fc = 0.1 * jax.random.normal(k_wf, (conv_dim, num_classes), jnp.float32)
    b_fc = 0.1 * jax.random.normal(k_bf, (num_classes,), jnp.float32)

    out = convolution_model_forward(x_tokens, embed_table, w_conv, b_conv, w_fc, b_fc)
    out = jax.block_until_ready(out)

    ref = reference_forward(x_tokens, embed_table, w_conv, b_conv, w_fc, b_fc)
    assert out.shape == (B, num_classes)
    assert jnp.allclose(out, ref, atol=5e-3, rtol=5e-3), (out, ref)

    print("KERNEL_OK")
</pallas_src>

<mosaic_0001>
module attributes {stable_mosaic.version = 11 : i64} {
  func.func @kernel(%arg0: i32, %arg1: memref<16x18xi32, #tpu.memory_space<vmem>>, %arg2: memref<128x128xbf16, #tpu.memory_space<vmem>>, %arg3: memref<128x128xbf16, #tpu.memory_space<vmem>>, %arg4: memref<128x128xbf16, #tpu.memory_space<vmem>>, %arg5: memref<128x128xf32, #tpu.memory_space<vmem>>, %arg6: memref<1x128xf32, #tpu.memory_space<vmem>>, %arg7: memref<16x8xf32, #tpu.memory_space<vmem>>) attributes {dimension_semantics = [#tpu.dimension_semantics<parallel>], iteration_bounds = array<i64: 1>, scalar_prefetch = 0 : i64, scratch_operands = 0 : i64, tpu.core_type = #tpu.core_type<tc>, window_params = [{transform_indices = @transform_0, window_bounds = array<i64: 16, 18>}, {pipeline_mode = #tpu.pipeline_mode<synchronous>, transform_indices = @transform_1, window_bounds = array<i64: 128, 128>}, {pipeline_mode = #tpu.pipeline_mode<synchronous>, transform_indices = @transform_2, window_bounds = array<i64: 128, 128>}, {pipeline_mode = #tpu.pipeline_mode<synchronous>, transform_indices = @transform_3, window_bounds = array<i64: 128, 128>}, {pipeline_mode = #tpu.pipeline_mode<synchronous>, transform_indices = @transform_4, window_bounds = array<i64: 128, 128>}, {pipeline_mode = #tpu.pipeline_mode<synchronous>, transform_indices = @transform_5, window_bounds = array<i64: 1, 128>}, {transform_indices = @transform_6, window_bounds = array<i64: 16, 8>}]} {
    %c0_i32 = arith.constant 0 : i32
    %c8_i32 = arith.constant 8 : i32
    %0 = arith.muli %c0_i32, %c8_i32 : i32
    %1 = tpu.assume_multiple %0, 8 : i32
    %2 = arith.index_cast %1 : i32 to index
    %c0 = arith.constant 0 : index
    %3 = vector.load %arg1[%2, %c0] : memref<16x18xi32, #tpu.memory_space<vmem>>, vector<8x18xi32>
    %4 = tpu.iota {dimensions = array<i32: 2>} : vector<8x16x128xi32>
    %5 = vector.extract_strided_slice %3 {offsets = [0, 0], sizes = [8, 16], strides = [1, 1]} : vector<8x18xi32> to vector<8x16xi32>
    %6 = vector.shape_cast %5 : vector<8x16xi32> to vector<8x16x1xi32>
    %7 = vector.broadcast %6 : vector<8x16x1xi32> to vector<8x16x128xi32>
    %8 = arith.cmpi eq, %4, %7 : vector<8x16x128xi32>
    %9 = arith.extui %8 : vector<8x16x128xi1> to vector<8x16x128xi32>
    %10 = arith.sitofp %9 : vector<8x16x128xi32> to vector<8x16x128xf32>
    %11 = arith.truncf %10 : vector<8x16x128xf32> to vector<8x16x128xbf16>
    %12 = vector.shape_cast %11 : vector<8x16x128xbf16> to vector<128x128xbf16>
    %c0_0 = arith.constant 0 : index
    %c0_1 = arith.constant 0 : index
    %13 = vector.load %arg2[%c0_0, %c0_1] : memref<128x128xbf16, #tpu.memory_space<vmem>>, vector<128x128xbf16>
    %cst = arith.constant dense<0.000000e+00> : vector<128x128xf32>
    %14 = tpu.matmul %12, %13, %cst {dimension_numbers = #tpu.dot_dimension_numbers<[1], [0], [0], [1], [0, 0, 1, 1], [], []>} : vector<128x128xbf16>, vector<128x128xbf16>, vector<128x128xf32> -> vector<128x128xf32>
    %15 = vector.extract_strided_slice %3 {offsets = [0, 1], sizes = [8, 16], strides = [1, 1]} : vector<8x18xi32> to vector<8x16xi32>
    %16 = vector.shape_cast %15 : vector<8x16xi32> to vector<8x16x1xi32>
    %17 = vector.broadcast %16 : vector<8x16x1xi32> to vector<8x16x128xi32>
    %18 = arith.cmpi eq, %4, %17 : vector<8x16x128xi32>
    %19 = arith.extui %18 : vector<8x16x128xi1> to vector<8x16x128xi32>
    %20 = arith.sitofp %19 : vector<8x16x128xi32> to vector<8x16x128xf32>
    %21 = arith.truncf %20 : vector<8x16x128xf32> to vector<8x16x128xbf16>
    %22 = vector.shape_cast %21 : vector<8x16x128xbf16> to vector<128x128xbf16>
    %c0_2 = arith.constant 0 : index
    %c0_3 = arith.constant 0 : index
    %23 = vector.load %arg3[%c0_2, %c0_3] : memref<128x128xbf16, #tpu.memory_space<vmem>>, vector<128x128xbf16>
    %cst_4 = arith.constant dense<0.000000e+00> : vector<128x128xf32>
    %24 = tpu.matmul %22, %23, %cst_4 {dimension_numbers = #tpu.dot_dimension_numbers<[1], [0], [0], [1], [0, 0, 1, 1], [], []>} : vector<128x128xbf16>, vector<128x128xbf16>, vector<128x128xf32> -> vector<128x128xf32>
    %25 = arith.addf %14, %24 : vector<128x128xf32>
    %26 = vector.extract_strided_slice %3 {offsets = [0, 2], sizes = [8, 16], strides = [1, 1]} : vector<8x18xi32> to vector<8x16xi32>
    %27 = vector.shape_cast %26 : vector<8x16xi32> to vector<8x16x1xi32>
    %28 = vector.broadcast %27 : vector<8x16x1xi32> to vector<8x16x128xi32>
    %29 = arith.cmpi eq, %4, %28 : vector<8x16x128xi32>
    %30 = arith.extui %29 : vector<8x16x128xi1> to vector<8x16x128xi32>
    %31 = arith.sitofp %30 : vector<8x16x128xi32> to vector<8x16x128xf32>
    %32 = arith.truncf %31 : vector<8x16x128xf32> to vector<8x16x128xbf16>
    %33 = vector.shape_cast %32 : vector<8x16x128xbf16> to vector<128x128xbf16>
    %c0_5 = arith.constant 0 : index
    %c0_6 = arith.constant 0 : index
    %34 = vector.load %arg4[%c0_5, %c0_6] : memref<128x128xbf16, #tpu.memory_space<vmem>>, vector<128x128xbf16>
    %cst_7 = arith.constant dense<0.000000e+00> : vector<128x128xf32>
    %35 = tpu.matmul %33, %34, %cst_7 {dimension_numbers = #tpu.dot_dimension_numbers<[1], [0], [0], [1], [0, 0, 1, 1], [], []>} : vector<128x128xbf16>, vector<128x128xbf16>, vector<128x128xf32> -> vector<128x128xf32>
    %36 = arith.addf %25, %35 : vector<128x128xf32>
    %cst_8 = arith.constant 0.000000e+00 : f32
    %37 = vector.broadcast %cst_8 : f32 to vector<128x128xf32>
    %38 = arith.maximumf %36, %37 : vector<128x128xf32>
    %39 = vector.shape_cast %38 : vector<128x128xf32> to vector<8x16x128xf32>
    %40 = vector.extract_strided_slice %39 {offsets = [0, 0, 0], sizes = [8, 14, 128], strides = [1, 1, 1]} : vector<8x16x128xf32> to vector<8x14x128xf32>
    %cst_9 = arith.constant dense<0xFF800000> : vector<8x128xf32>
    %41 = vector.multi_reduction <maximumf>, %40, %cst_9 [1] : vector<8x14x128xf32> to vector<8x128xf32>
    %c0_10 = arith.constant 0 : index
    %c0_11 = arith.constant 0 : index
    %42 = vector.load %arg5[%c0_10, %c0_11] : memref<128x128xf32, #tpu.memory_space<vmem>>, vector<128x128xf32>
    %cst_12 = arith.constant dense<0.000000e+00> : vector<8x128xf32>
    %43 = tpu.matmul %41, %42, %cst_12 {dimension_numbers = #tpu.dot_dimension_numbers<[1], [0], [0], [1], [0, 0, 1, 1], [], []>} : vector<8x128xf32>, vector<128x128xf32>, vector<8x128xf32> -> vector<8x128xf32>
    %c0_13 = arith.constant 0 : index
    %c0_14 = arith.constant 0 : index
    %44 = vector.load %arg6[%c0_13, %c0_14] : memref<1x128xf32, #tpu.memory_space<vmem>>, vector<1x128xf32>
    %45 = vector.broadcast %44 : vector<1x128xf32> to vector<8x128xf32>
    %46 = arith.addf %43, %45 : vector<8x128xf32>
    %47 = vector.extract_strided_slice %46 {offsets = [0, 0], sizes = [8, 8], strides = [1, 1]} : vector<8x128xf32> to vector<8x8xf32>
    %48 = arith.index_cast %1 : i32 to index
    %c0_15 = arith.constant 0 : index
    %49 = vector.load %arg7[%48, %c0_15] : memref<16x8xf32, #tpu.memory_space<vmem>>, vector<8x8xf32>
    tpu.vector_store %arg7[%48, %c0_15], %47 {strides = array<i32>} : memref<16x8xf32, #tpu.memory_space<vmem>>, vector<8x8xf32>,
    %c1_i32 = arith.constant 1 : i32
    %c8_i32_16 = arith.constant 8 : i32
    %50 = arith.muli %c1_i32, %c8_i32_16 : i32
    %51 = tpu.assume_multiple %50, 8 : i32
    %52 = arith.index_cast %51 : i32 to index
    %c0_17 = arith.constant 0 : index
    %53 = vector.load %arg1[%52, %c0_17] : memref<16x18xi32, #tpu.memory_space<vmem>>, vector<8x18xi32>
    %54 = tpu.iota {dimensions = array<i32: 2>} : vector<8x16x128xi32>
    %55 = vector.extract_strided_slice %53 {offsets = [0, 0], sizes = [8, 16], strides = [1, 1]} : vector<8x18xi32> to vector<8x16xi32>
    %56 = vector.shape_cast %55 : vector<8x16xi32> to vector<8x16x1xi32>
    %57 = vector.broadcast %56 : vector<8x16x1xi32> to vector<8x16x128xi32>
    %58 = arith.cmpi eq, %54, %57 : vector<8x16x128xi32>
    %59 = arith.extui %58 : vector<8x16x128xi1> to vector<8x16x128xi32>
    %60 = arith.sitofp %59 : vector<8x16x128xi32> to vector<8x16x128xf32>
    %61 = arith.truncf %60 : vector<8x16x128xf32> to vector<8x16x128xbf16>
    %62 = vector.shape_cast %61 : vector<8x16x128xbf16> to vector<128x128xbf16>
    %c0_18 = arith.constant 0 : index
    %c0_19 = arith.constant 0 : index
    %63 = vector.load %arg2[%c0_18, %c0_19] : memref<128x128xbf16, #tpu.memory_space<vmem>>, vector<128x128xbf16>
    %cst_20 = arith.constant dense<0.000000e+00> : vector<128x128xf32>
    %64 = tpu.matmul %62, %63, %cst_20 {dimension_numbers = #tpu.dot_dimension_numbers<[1], [0], [0], [1], [0, 0, 1, 1], [], []>} : vector<128x128xbf16>, vector<128x128xbf16>, vector<128x128xf32> -> vector<128x128xf32>
    %65 = vector.extract_strided_slice %53 {offsets = [0, 1], sizes = [8, 16], strides = [1, 1]} : vector<8x18xi32> to vector<8x16xi32>
    %66 = vector.shape_cast %65 : vector<8x16xi32> to vector<8x16x1xi32>
    %67 = vector.broadcast %66 : vector<8x16x1xi32> to vector<8x16x128xi32>
    %68 = arith.cmpi eq, %54, %67 : vector<8x16x128xi32>
    %69 = arith.extui %68 : vector<8x16x128xi1> to vector<8x16x128xi32>
    %70 = arith.sitofp %69 : vector<8x16x128xi32> to vector<8x16x128xf32>
    %71 = arith.truncf %70 : vector<8x16x128xf32> to vector<8x16x128xbf16>
    %72 = vector.shape_cast %71 : vector<8x16x128xbf16> to vector<128x128xbf16>
    %c0_21 = arith.constant 0 : index
    %c0_22 = arith.constant 0 : index
    %73 = vector.load %arg3[%c0_21, %c0_22] : memref<128x128xbf16, #tpu.memory_space<vmem>>, vector<128x128xbf16>
    %cst_23 = arith.constant dense<0.000000e+00> : vector<128x128xf32>
    %74 = tpu.matmul %72, %73, %cst_23 {dimension_numbers = #tpu.dot_dimension_numbers<[1], [0], [0], [1], [0, 0, 1, 1], [], []>} : vector<128x128xbf16>, vector<128x128xbf16>, vector<128x128xf32> -> vector<128x128xf32>
    %75 = arith.addf %64, %74 : vector<128x128xf32>
    %76 = vector.extract_strided_slice %53 {offsets = [0, 2], sizes = [8, 16], strides = [1, 1]} : vector<8x18xi32> to vector<8x16xi32>
    %77 = vector.shape_cast %76 : vector<8x16xi32> to vector<8x16x1xi32>
    %78 = vector.broadcast %77 : vector<8x16x1xi32> to vector<8x16x128xi32>
    %79 = arith.cmpi eq, %54, %78 : vector<8x16x128xi32>
    %80 = arith.extui %79 : vector<8x16x128xi1> to vector<8x16x128xi32>
    %81 = arith.sitofp %80 : vector<8x16x128xi32> to vector<8x16x128xf32>
    %82 = arith.truncf %81 : vector<8x16x128xf32> to vector<8x16x128xbf16>
    %83 = vector.shape_cast %82 : vector<8x16x128xbf16> to vector<128x128xbf16>
    %c0_24 = arith.constant 0 : index
    %c0_25 = arith.constant 0 : index
    %84 = vector.load %arg4[%c0_24, %c0_25] : memref<128x128xbf16, #tpu.memory_space<vmem>>, vector<128x128xbf16>
    %cst_26 = arith.constant dense<0.000000e+00> : vector<128x128xf32>
    %85 = tpu.matmul %83, %84, %cst_26 {dimension_numbers = #tpu.dot_dimension_numbers<[1], [0], [0], [1], [0, 0, 1, 1], [], []>} : vector<128x128xbf16>, vector<128x128xbf16>, vector<128x128xf32> -> vector<128x128xf32>
    %86 = arith.addf %75, %85 : vector<128x128xf32>
    %cst_27 = arith.constant 0.000000e+00 : f32
    %87 = vector.broadcast %cst_27 : f32 to vector<128x128xf32>
    %88 = arith.maximumf %86, %87 : vector<128x128xf32>
    %89 = vector.shape_cast %88 : vector<128x128xf32> to vector<8x16x128xf32>
    %90 = vector.extract_strided_slice %89 {offsets = [0, 0, 0], sizes = [8, 14, 128], strides = [1, 1, 1]} : vector<8x16x128xf32> to vector<8x14x128xf32>
    %cst_28 = arith.constant dense<0xFF800000> : vector<8x128xf32>
    %91 = vector.multi_reduction <maximumf>, %90, %cst_28 [1] : vector<8x14x128xf32> to vector<8x128xf32>
    %c0_29 = arith.constant 0 : index
    %c0_30 = arith.constant 0 : index
    %92 = vector.load %arg5[%c0_29, %c0_30] : memref<128x128xf32, #tpu.memory_space<vmem>>, vector<128x128xf32>
    %cst_31 = arith.constant dense<0.000000e+00> : vector<8x128xf32>
    %93 = tpu.matmul %91, %92, %cst_31 {dimension_numbers = #tpu.dot_dimension_numbers<[1], [0], [0], [1], [0, 0, 1, 1], [], []>} : vector<8x128xf32>, vector<128x128xf32>, vector<8x128xf32> -> vector<8x128xf32>
    %c0_32 = arith.constant 0 : index
    %c0_33 = arith.constant 0 : index
    %94 = vector.load %arg6[%c0_32, %c0_33] : memref<1x128xf32, #tpu.memory_space<vmem>>, vector<1x128xf32>
    %95 = vector.broadcast %94 : vector<1x128xf32> to vector<8x128xf32>
    %96 = arith.addf %93, %95 : vector<8x128xf32>
    %97 = vector.extract_strided_slice %96 {offsets = [0, 0], sizes = [8, 8], strides = [1, 1]} : vector<8x128xf32> to vector<8x8xf32>
    %98 = arith.index_cast %51 : i32 to index
    %c0_34 = arith.constant 0 : index
    %99 = vector.load %arg7[%98, %c0_34] : memref<16x8xf32, #tpu.memory_space<vmem>>, vector<8x8xf32>
    tpu.vector_store %arg7[%98, %c0_34], %97 {strides = array<i32>} : memref<16x8xf32, #tpu.memory_space<vmem>>, vector<8x8xf32>,
    %c2_i32 = arith.constant 2 : i32
    return
  }
  func.func @transform_0(%arg0: i32) -> (i32, i32) {
    %c0_i32 = arith.constant 0 : i32
    %c0_i32_0 = arith.constant 0 : i32
    return %arg0, %c0_i32 : i32, i32
  }
  func.func @transform_1(%arg0: i32) -> (i32, i32) {
    %c0_i32 = arith.constant 0 : i32
    %c0_i32_0 = arith.constant 0 : i32
    %c0_i32_1 = arith.constant 0 : i32
    return %c0_i32, %c0_i32_0 : i32, i32
  }
  func.func @transform_2(%arg0: i32) -> (i32, i32) {
    %c0_i32 = arith.constant 0 : i32
    %c0_i32_0 = arith.constant 0 : i32
    %c0_i32_1 = arith.constant 0 : i32
    return %c0_i32, %c0_i32_0 : i32, i32
  }
  func.func @transform_3(%arg0: i32) -> (i32, i32) {
    %c0_i32 = arith.constant 0 : i32
    %c0_i32_0 = arith.constant 0 : i32
    %c0_i32_1 = arith.constant 0 : i32
    return %c0_i32, %c0_i32_0 : i32, i32
  }
  func.func @transform_4(%arg0: i32) -> (i32, i32) {
    %c0_i32 = arith.constant 0 : i32
    %c0_i32_0 = arith.constant 0 : i32
    %c0_i32_1 = arith.constant 0 : i32
    return %c0_i32, %c0_i32_0 : i32, i32
  }
  func.func @transform_5(%arg0: i32) -> (i32, i32) {
    %c0_i32 = arith.constant 0 : i32
    %c0_i32_0 = arith.constant 0 : i32
    %c0_i32_1 = arith.constant 0 : i32
    return %c0_i32, %c0_i32_0 : i32, i32
  }
  func.func @transform_6(%arg0: i32) -> (i32, i32) {
    %c0_i32 = arith.constant 0 : i32
    %c0_i32_0 = arith.constant 0 : i32
    return %arg0, %c0_i32 : i32, i32
  }
}

</mosaic_0001>

<bundles_post_ra>
// kernel: tpu_custom_call.1
= control target key start
LH: loop header
LB: loop body
LE: loop exit
PB: predicated region body
PF: predicated region fallthrough
CT: control target
= control target key end

     0   :  { %11 = vsyncpa [#allocation3], 0  ;;  %s3704_s0 = inlined_call_operand.hbm [shape: s32[16,18], index: 0, kind: input, shape index: {}]   ;;  %s3705_s1 = inlined_call_operand.hbm [shape: bf16[128,128], index: 1, kind: input, shape index: {}]   ;;  %s3706_s2 = inlined_call_operand.hbm [shape: bf16[128,128], index: 2, kind: input, shape index: {}]   ;;  %s3707_s3 = inlined_call_operand.hbm [shape: bf16[128,128], index: 3, kind: input, shape index: {}]   ;;  %s3708_s4 = inlined_call_operand.hbm [shape: f32[128,128], index: 4, kind: input, shape index: {}]   ;;  %s3709_s5 = inlined_call_operand.vmem [shape: f32[1,128], index: 5, kind: input, shape index: {}]   ;;  %s3710_s6 = inlined_call_operand.vmem [shape: f32[16,8], index: 6, kind: output, shape index: {}]  }
   0x1   :  { %12 = vsyncpa [#allocation5], 0 }
   0x2   :  { %13 = vsyncpa [#allocation8], 0  ;;  %s3184_s21 = smov [#allocation4]   ;;  %s3068_s25 = scalar_lea.hbm %s3705_s1, 1024 }
   0x3   :  { %s31_s22 = sshll.u32 %s3184_s21, 4  ;;  %p3069_p0 = scmp.ne.s32.totalorder %s3705_s1, %s3068_s25  ;;  %s32_s22 = int_to_ptr.vmem [resolvable:$true] %s31_s22 }
   0x4   :  { %p3072_p1 = scmp.lt.u32.totalorder %s3068_s25, %s3705_s1 }
   0x6   :  { %p3074_p2 = pnand %p3072_p1, %p3069_p0 }
   0x8   :  { %3077 = shalt.err (!%p3074_p2)
}
   0x9   :  { %s3078_s30 = scalar_lea.vmem %s32_s22, 1024  ;;  %p3083_p4 = scmp.lt.s32.totalorder %s32_s22, %s32_s22 }
   0xa   :  { %p3079_p3 = scmp.ne.s32.totalorder %s32_s22, %s3078_s30  ;;  %p3084_p5 = scmp.lt.s32.totalorder %s3078_s30, %s3078_s30 }
   0xc   :  { %p3085_p6 = por %p3084_p5, %p3083_p4 }
   0xe   :  { %p3086_p7 = pnand %p3085_p6, %p3079_p3 }
  0x10   :  { %3089 = shalt.err (!%p3086_p7)
}
  0x11   :  { %s3185_s7 = smov 64   ;;  %s3186_s8 = smov 4  }
  0x12   :  { %37 = dma.hbm_to_vmem [thread:$0]  %s3705_s1, 1024, %s32_s22, [#allocation5], %s3185_s7, %s3185_s7, %s3186_s8  }
  0x13   :  { %s3187_s11 = smov [#allocation7]   ;;  %s3188_s13 = smov [#allocation2]  }
  0x14   :  { %s55_s12 = sshll.u32 %s3187_s11, 4  ;;  %s19_s14 = sshll.u32 %s3188_s13, 4  ;;  %s56_s12 = int_to_ptr.vmem [resolvable:$true] %s55_s12  ;;  %s20_s14 = int_to_ptr.vmem [resolvable:$true] %s19_s14 }
  0x15   :  { %s3090_s17 = scalar_lea.hbm %s3707_s3, 1024 }
  0x16   :  { %p3091_p8 = scmp.ne.s32.totalorder %s3707_s3, %s3090_s17  ;;  %p3094_p9 = scmp.lt.u32.totalorder %s3090_s17, %s3707_s3 }
  0x18   :  { %p3096_p10 = pnand %p3094_p9, %p3091_p8 }
  0x1a   :  { %3099 = shalt.err (!%p3096_p10)
}
  0x1b   :  { %s3100_s1 = scalar_lea.vmem %s56_s12, 1024  ;;  %p3105_p12 = scmp.lt.s32.totalorder %s56_s12, %s56_s12 }
  0x1c   :  { %p3101_p11 = scmp.ne.s32.totalorder %s56_s12, %s3100_s1  ;;  %p3106_p13 = scmp.lt.s32.totalorder %s3100_s1, %s3100_s1 }
  0x1e   :  { %p3107_p0 = por %p3106_p13, %p3105_p12 }
  0x20   :  { %p3108_p1 = pnand %p3107_p0, %p3101_p11 }
  0x22   :  { %3111 = shalt.err (!%p3108_p1)
}
  0x23   :  { %61 = dma.hbm_to_vmem [thread:$0]  %s3707_s3, 1024, %s56_s12, [#allocation8], %s3185_s7, %s3185_s7, %s3186_s8  }
  0x24   :  { %s3112_s26 = scalar_lea.hbm %s3704_s0, 256 }
  0x25   :  { %p3113_p2 = scmp.ne.s32.totalorder %s3704_s0, %s3112_s26  ;;  %p3116_p3 = scmp.lt.u32.totalorder %s3112_s26, %s3704_s0 }
  0x27   :  { %p3118_p4 = pnand %p3116_p3, %p3113_p2 }
  0x29   :  { %3121 = shalt.err (!%p3118_p4)
}
  0x2a   :  { %s3122_s9 = scalar_lea.vmem %s20_s14, 256  ;;  %p3127_p6 = scmp.lt.s32.totalorder %s20_s14, %s20_s14 }
  0x2b   :  { %p3123_p5 = scmp.ne.s32.totalorder %s20_s14, %s3122_s9  ;;  %p3128_p7 = scmp.lt.s32.totalorder %s3122_s9, %s3122_s9 }
  0x2d   :  { %p3129_p8 = por %p3128_p7, %p3127_p6 }
  0x2f   :  { %p3130_p9 = pnand %p3129_p8, %p3123_p5 }
  0x31   :  { %3133 = shalt.err (!%p3130_p9)
}
  0x32   :  { %s3189_s3 = smov 128   ;;  %s3190_s10 = smov 8  }
  0x33   :  { %25 = dma.hbm_to_vmem [thread:$0]  %s3704_s0, 256, %s20_s14, [#allocation3], %s3189_s3, %s3189_s3, %s3190_s10  }
  0x34   :  { %s3191_s13 = smov [#allocation6]   ;;  %s3192_s16 = smov [#allocation9]  }
  0x35   :  { %s43_s15 = sshll.u32 %s3191_s13, 4  ;;  %s67_s17 = sshll.u32 %s3192_s16, 4  ;;  %s44_s15 = int_to_ptr.vmem [resolvable:$true] %s43_s15  ;;  %s68_s17 = int_to_ptr.vmem [resolvable:$true] %s67_s17 }
  0x36   :  { %s3134_s20 = scalar_lea.hbm %s3706_s2, 1024 }
  0x37   :  { %p3135_p10 = scmp.ne.s32.totalorder %s3706_s2, %s3134_s20  ;;  %p3138_p11 = scmp.lt.u32.totalorder %s3134_s20, %s3706_s2 }
  0x39   :  { %p3140_p12 = pnand %p3138_p11, %p3135_p10 }
  0x3b   :  { %3143 = shalt.err (!%p3140_p12)
}
  0x3c   :  { %s3144_s0 = scalar_lea.vmem %s44_s15, 1024  ;;  %p3149_p0 = scmp.lt.s32.totalorder %s44_s15, %s44_s15 }
  0x3d   :  { %p3145_p13 = scmp.ne.s32.totalorder %s44_s15, %s3144_s0  ;;  %p3150_p1 = scmp.lt.s32.totalorder %s3144_s0, %s3144_s0 }
  0x3f   :  { %p3151_p2 = por %p3150_p1, %p3149_p0 }
  0x41   :  { %p3152_p3 = pnand %p3151_p2, %p3145_p13 }
  0x43   :  { %3155 = shalt.err (!%p3152_p3)
}
  0x44   :  { %49 = dma.hbm_to_vmem [thread:$0]  %s3706_s2, 1024, %s44_s15, [#allocation5], %s3185_s7, %s3185_s7, %s3186_s8  }
  0x45   :  { %s3156_s27 = scalar_lea.hbm %s3708_s4, 2048 }
  0x46   :  { %p3157_p4 = scmp.ne.s32.totalorder %s3708_s4, %s3156_s27  ;;  %p3160_p5 = scmp.lt.u32.totalorder %s3156_s27, %s3708_s4 }
  0x48   :  { %p3162_p6 = pnand %p3160_p5, %p3157_p4 }
  0x4a   :  { %3165 = shalt.err (!%p3162_p6)
}
  0x4b   :  { %s3166_s11 = scalar_lea.vmem %s68_s17, 2048  ;;  %p3171_p8 = scmp.lt.s32.totalorder %s68_s17, %s68_s17 }
  0x4c   :  { %p3167_p7 = scmp.ne.s32.totalorder %s68_s17, %s3166_s11  ;;  %p3172_p9 = scmp.lt.s32.totalorder %s3166_s11, %s3166_s11 }
  0x4e   :  { %p3173_p10 = por %p3172_p9, %p3171_p8 }
  0x50   :  { %p3174_p11 = pnand %p3173_p10, %p3167_p7 }
  0x52   :  { %3177 = shalt.err (!%p3174_p11)
}
  0x53   :  { %73 = dma.hbm_to_vmem [thread:$0]  %s3708_s4, 2048, %s68_s17, [#allocation8], %s3189_s3, %s3189_s3, %s3190_s10  }
  0x54   :  { %3178 = dma.done.wait [#allocation3], 256  }
  0x55   :  { %3179 = vsyncadd [#allocation3], 4294967040 }
  0x56   :  { %3180 = dma.done.wait [#allocation5], 2048  }
  0x57   :  { %3181 = vsyncadd [#allocation5], 4294965248 }
  0x58   :  { %3182 = dma.done.wait [#allocation8], 3072  }
  0x59   :  { %3183 = vsyncadd [#allocation8], 4294964224  ;;  %v93_v0 = vlaneseq  ;;  %v92_v4 = vld [vmem:[#allocation2] sm:$0xff]  ;;  %v3020_v7 = vld [vmem:[#allocation6] sm:$0xff]   ;;  %v3193_v43 = vmov 1.0|1.0  }
  0x5a   :  { %v3021_v8 = vld [vmem:[#allocation6 + $0x8] sm:$0xff]   ;;  %2633 = vmatprep.subr.bf16.mxu0 %v3020_v7  ;;  %v3022_v10 = vld [vmem:[#allocation6 + $0x10] sm:$0xff]   ;;  %v3023_v13 = vld [vmem:[#allocation6 + $0x18] sm:$0xff]  }
  0x5b   :  { %v3308_v1 = vshrl.u32 %v93_v0, 7  ;;  %2634 = vmatpush3.bf16.msra.mxu0 %v3020_v7  ;;  %v3024_v17 = vld [vmem:[#allocation6 + $0x20] sm:$0xff]   ;;  %v3025_v20 = vld [vmem:[#allocation6 + $0x28] sm:$0xff]   ;;  %v3026_v22 = vld [vmem:[#allocation6 + $0x30] sm:$0xff]   ;;  %v3396_v37 = vand.u32 127, %v93_v0 }
  0x5c   :  { %2635 = vmatprep.subr.bf16.mxu0 %v3021_v8  ;;  %v3027_v25 = vld [vmem:[#allocation6 + $0x38] sm:$0xff]   ;;  %v3346_v27 = vld [vmem:[#allocation4] sm:$0xff]   ;;  %v3029_v42 = vld [vmem:[#allocation4 + $0x8] sm:$0xff]  }
  0x5d   :  { %v108_v2 = vsub.s32 1, %v3308_v1  ;;  %v97_v3 = vsub.s32 0, %v3308_v1  ;;  %v119_v9 = vsub.s32 2, %v3308_v1  ;;  %v130_v12 = vsub.s32 3, %v3308_v1  ;;  %v1178_v28 = vld [vmem:[#allocation2 + $0x8] sm:$0xff]  ;;  %v3030_v46 = vld [vmem:[#allocation4 + $0x10] sm:$0xff]  }
  0x5e   :  { %v141_v15 = vsub.s32 4, %v3308_v1  ;;  %v152_v16 = vsub.s32 5, %v3308_v1  ;;  %v163_v19 = vsub.s32 6, %v3308_v1  ;;  %v174_v24 = vsub.s32 7, %v3308_v1  ;;  %v3031_v49 = vld [vmem:[#allocation4 + $0x18] sm:$0xff]   ;;  %v3032_v52 = vld [vmem:[#allocation4 + $0x20] sm:$0xff]  }
  0x5f   :  { %v3314_v5 = vrot.slane %v92_v4, %v108_v2  ;;  %v3318_v6 = vrot.slane %v92_v4, %v97_v3  ;;  %v3327_v11 = vrot.slane %v92_v4, %v119_v9  ;;  %2636 = vmatpush3.bf16.msra.mxu0 %v3021_v8  ;;  %v131_v14 = vrot.slane %v92_v4, %v130_v12  ;;  %v3033_v55 = vld [vmem:[#allocation4 + $0x28] sm:$0xff]   ;;  %v3034_v58 = vld [vmem:[#allocation4 + $0x30] sm:$0xff]   ;;  %v3035_v61 = vld [vmem:[#allocation4 + $0x38] sm:$0xff]  }
  0x60   :  { %2637 = vmatprep.subr.bf16.mxu0 %v3022_v10  ;;  %v142_v18 = vrot.slane %v92_v4, %v141_v15  ;;  %v153_v21 = vrot.slane %v92_v4, %v152_v16  ;;  %v164_v23 = vrot.slane %v92_v4, %v163_v19  ;;  %v175_v26 = vrot.slane %v92_v4, %v174_v24  ;;  %v3036_v0 = vld [vmem:[#allocation7] sm:$0xff]  }
  0x61   :  { %265 = vbcast.lane.b32.xlu1 %v3314_v5, 257  ;;  %257 = vbcast.lane.b32.xlu0 %v3318_v6, 257  ;;  %v3363_v29 = vrot.slane %v1178_v28, %v97_v3  ;;  %v3369_v30 = vrot.slane %v1178_v28, %v108_v2  ;;  %v3375_v31 = vrot.slane %v1178_v28, %v119_v9  ;;  %v3037_v3 = vld [vmem:[#allocation7 + $0x8] sm:$0xff]   ;;  %v3039_v9 = vld [vmem:[#allocation7 + $0x18] sm:$0xff]  }
  0x62   :  { %v3381_v32 = vrot.slane %v1178_v28, %v130_v12  ;;  %v3387_v33 = vrot.slane %v1178_v28, %v141_v15  ;;  %v3393_v34 = vrot.slane %v1178_v28, %v152_v16  ;;  %v3402_v38 = vrot.slane %v1178_v28, %v163_v19  ;;  %v3040_v12 = vld [vmem:[#allocation7 + $0x20] sm:$0xff]   ;;  %v3041_v15 = vld [vmem:[#allocation7 + $0x28] sm:$0xff]  }
  0x63   :  { %2638 = vmatpush3.bf16.msra.mxu0 %v3022_v10  ;;  %v3412_v41 = vrot.slane %v1178_v28, %v174_v24 }
  0x64   :  { %2639 = vmatprep.subr.bf16.mxu0 %v3023_v13 }
  0x65   :  { %269 = vbcast.lane.b32.xlu1 %v3314_v5, 265  ;;  %261 = vbcast.lane.b32.xlu0 %v3318_v6, 265 }
  0x67   :  { %2640 = vmatpush3.bf16.msra.mxu0 %v3023_v13 }
  0x68   :  { %2641 = vmatprep.subr.bf16.mxu0 %v3024_v17 }
  0x69   :  { %277 = vbcast.lane.b32.xlu1 %v3327_v11, 265  ;;  %273 = vbcast.lane.b32.xlu0 %v3327_v11, 257 }
  0x6b   :  { %2642 = vmatpush3.bf16.msra.mxu0 %v3024_v17 }
  0x6c   :  { %2643 = vmatprep.subr.bf16.mxu0 %v3025_v20 }
  0x6d   :  { %285 = vbcast.lane.b32.xlu1 %v131_v14, 265  ;;  %281 = vbcast.lane.b32.xlu0 %v131_v14, 257 }
  0x6f   :  { %2644 = vmatpush3.bf16.msra.mxu0 %v3025_v20 }
  0x70   :  { %2645 = vmatprep.subr.bf16.mxu0 %v3026_v22 }
  0x71   :  { %293 = vbcast.lane.b32.xlu1 %v142_v18, 265  ;;  %289 = vbcast.lane.b32.xlu0 %v142_v18, 257 }
  0x73   :  { %2646 = vmatpush3.bf16.msra.mxu0 %v3026_v22 }
  0x74   :  { %2647 = vmatprep.subr.bf16.mxu0 %v3027_v25 }
  0x75   :  { %301 = vbcast.lane.b32.xlu1 %v153_v21, 265  ;;  %297 = vbcast.lane.b32.xlu0 %v153_v21, 257 }
  0x77   :  { %2648 = vmatpush3.bf16.msra.mxu0 %v3027_v25 }
  0x78   :  { %2665 = vmatprep.subr.bf16.mxu0 %v3346_v27 }
  0x79   :  { %309 = vbcast.lane.b32.xlu1 %v164_v23, 265  ;;  %305 = vbcast.lane.b32.xlu0 %v164_v23, 257 }
  0x7d   :  { %317 = vbcast.lane.b32.xlu1 %v175_v26, 265  ;;  %313 = vbcast.lane.b32.xlu0 %v175_v26, 257 }
  0x81   :  { %104 = vbcast.lane.b32.xlu1 %v3318_v6, 264  ;;  %100 = vbcast.lane.b32.xlu0 %v3318_v6, 256 }
  0x85   :  { %115 = vbcast.lane.b32.xlu1 %v3314_v5, 264  ;;  %111 = vbcast.lane.b32.xlu0 %v3314_v5, 256 }
  0x89   :  { %126 = vbcast.lane.b32.xlu1 %v3327_v11, 264  ;;  %122 = vbcast.lane.b32.xlu0 %v3327_v11, 256 }
  0x8d   :  { %137 = vbcast.lane.b32.xlu1 %v131_v14, 264  ;;  %133 = vbcast.lane.b32.xlu0 %v131_v14, 256 }
  0x91   :  { %148 = vbcast.lane.b32.xlu1 %v142_v18, 264  ;;  %144 = vbcast.lane.b32.xlu0 %v142_v18, 256 }
  0x95   :  { %159 = vbcast.lane.b32.xlu1 %v153_v21, 264  ;;  %155 = vbcast.lane.b32.xlu0 %v153_v21, 256 }
  0x99   :  { %170 = vbcast.lane.b32.xlu1 %v164_v23, 264  ;;  %166 = vbcast.lane.b32.xlu0 %v164_v23, 256 }
  0x9d   :  { %181 = vbcast.lane.b32.xlu1 %v175_v26, 264  ;;  %177 = vbcast.lane.b32.xlu0 %v175_v26, 256 }
  0xa1   :  { %687 = vbcast.lane.b32.xlu1 %v3318_v6, 266  ;;  %683 = vbcast.lane.b32.xlu0 %v3318_v6, 258  ;;  %v3038_v6 = vld [vmem:[#allocation7 + $0x10] sm:$0xff]  }
  0xa5   :  { %695 = vbcast.lane.b32.xlu1 %v3314_v5, 266  ;;  %691 = vbcast.lane.b32.xlu0 %v3314_v5, 258 }
  0xa9   :  { %703 = vbcast.lane.b32.xlu1 %v3327_v11, 266  ;;  %699 = vbcast.lane.b32.xlu0 %v3327_v11, 258 }
  0xad   :  { %711 = vbcast.lane.b32.xlu1 %v131_v14, 266  ;;  %707 = vbcast.lane.b32.xlu0 %v131_v14, 258 }
  0xb1   :  { %719 = vbcast.lane.b32.xlu1 %v142_v18, 266  ;;  %715 = vbcast.lane.b32.xlu0 %v142_v18, 258  ;;  %v3042_v18 = vld [vmem:[#allocation7 + $0x30] sm:$0xff]  }
  0xb5   :  { %727 = vbcast.lane.b32.xlu1 %v153_v21, 266  ;;  %723 = vbcast.lane.b32.xlu0 %v153_v21, 258  ;;  %v3043_v21 = vld [vmem:[#allocation7 + $0x38] sm:$0xff]  }
  0xb9   :  { %735 = vbcast.lane.b32.xlu1 %v164_v23, 266  ;;  %731 = vbcast.lane.b32.xlu0 %v164_v23, 258 }
  0xbd   :  { %743 = vbcast.lane.b32.xlu1 %v175_v26, 266  ;;  %739 = vbcast.lane.b32.xlu0 %v175_v26, 258 }
  0xc1   :  { %1345 = vbcast.lane.b32.xlu1 %v3363_v29, 265  ;;  %1341 = vbcast.lane.b32.xlu0 %v3363_v29, 257 }
  0xc5   :  { %1353 = vbcast.lane.b32.xlu1 %v3369_v30, 265  ;;  %1349 = vbcast.lane.b32.xlu0 %v3369_v30, 257 }
  0xc9   :  { %1361 = vbcast.lane.b32.xlu1 %v3375_v31, 265  ;;  %1357 = vbcast.lane.b32.xlu0 %v3375_v31, 257 }
  0xcd   :  { %1369 = vbcast.lane.b32.xlu1 %v3381_v32, 265  ;;  %1365 = vbcast.lane.b32.xlu0 %v3381_v32, 257 }
  0xd1   :  { %1377 = vbcast.lane.b32.xlu1 %v3387_v33, 265  ;;  %1373 = vbcast.lane.b32.xlu0 %v3387_v33, 257 }
  0xd3   :  { %v266_v35 = vpop.permute.xlu1 %265  ;;  %v258_v36 = vpop.permute.xlu0 %257 }
  0xd4   :  { %vm321_vm0 = vcmp.eq.s32.totalorder %v3396_v37, %v266_v35  ;;  %vm319_vm3 = vcmp.eq.s32.totalorder %v3396_v37, %v258_v36 }
  0xd5   :  { %1385 = vbcast.lane.b32.xlu1 %v3393_v34, 265  ;;  %1381 = vbcast.lane.b32.xlu0 %v3393_v34, 257 }
  0xd7   :  { %v270_v39 = vpop.permute.xlu1 %269  ;;  %v262_v40 = vpop.permute.xlu0 %261 }
  0xd8   :  { %vm322_vm1 = vcmp.eq.s32.totalorder %v3396_v37, %v270_v39  ;;  %vm320_vm2 = vcmp.eq.s32.totalorder %v3396_v37, %v262_v40  ;;  %v1059_v39 = vld [vmem:[#allocation9] sm:$0xff]  ;;  %v1060_v40 = vld [vmem:[#allocation9 + $0x8] sm:$0xff] }
  0xd9   :  { %vm2302_vm4 = vmpackc.low %vm322_vm1, %vm321_vm0  ;;  %1393 = vbcast.lane.b32.xlu1 %v3402_v38, 265  ;;  %1389 = vbcast.lane.b32.xlu0 %v3402_v38, 257 }
  0xda   :  { %vm2300_vm5 = vmpackc.low %vm320_vm2, %vm319_vm3 }
  0xdb   :  { %2649 = vmatprep.mubr.msk.bf16.mxu0 %vm2300_vm5, %v3193_v43  ;;  %v278_v44 = vpop.permute.xlu1 %277  ;;  %v274_v45 = vpop.permute.xlu0 %273 }
  0xdc   :  { %2650 = vmatmul.mubr.msk.bf16.vlgmr.msra.gmra.mrb[0].mxu0 %vm2302_vm4, %v3193_v43  ;;  %vm324_vm6 = vcmp.eq.s32.totalorder %v3396_v37, %v278_v44  ;;  %vm323_vm7 = vcmp.eq.s32.totalorder %v3396_v37, %v274_v45  ;;  %v1061_v44 = vld [vmem:[#allocation9 + $0x10] sm:$0xff]  ;;  %v1062_v45 = vld [vmem:[#allocation9 + $0x18] sm:$0xff] }
  0xdd   :  { %2666 = vmatpush3.bf16.msra.mxu0 %v3346_v27  ;;  %vm2304_vm8 = vmpackc.low %vm324_vm6, %vm323_vm7  ;;  %1401 = vbcast.lane.b32.xlu1 %v3412_v41, 265 }
  0xde   :  { %2653 = vmatprep.mubr.msk.bf16.mxu0 %vm2304_vm8, %v3193_v43  ;;  %2667 = vmatprep.subr.bf16.mxu0 %v3029_v42 }
  0xdf   :  { %v286_v47 = vpop.permute.xlu1 %285  ;;  %v282_v48 = vpop.permute.xlu0 %281  ;;  %1397 = vbcast.lane.b32.xlu0 %v3412_v41, 257 }
  0xe0   :  { %vm326_vm9 = vcmp.eq.s32.totalorder %v3396_v37, %v286_v47  ;;  %vm325_vm10 = vcmp.eq.s32.totalorder %v3396_v37, %v282_v48  ;;  %v1063_v47 = vld [vmem:[#allocation9 + $0x20] sm:$0xff]  ;;  %v1064_v48 = vld [vmem:[#allocation9 + $0x28] sm:$0xff] }
  0xe1   :  { %2668 = vmatpush3.bf16.msra.mxu0 %v3029_v42  ;;  %vm2306_vm11 = vmpackc.low %vm326_vm9, %vm325_vm10  ;;  %1188 = vbcast.lane.b32.xlu1 %v3363_v29, 264  ;;  %v3194_v42 = vmov 0.0|0.0  }
  0xe2   :  { %2669 = vmatprep.subr.bf16.mxu0 %v3030_v46  ;;  %2895 = vmatprep.subr.bf16.mxu1 %v3194_v42 }
  0xe3   :  { %v294_v50 = vpop.permute.xlu1 %293  ;;  %v290_v51 = vpop.permute.xlu0 %289  ;;  %1184 = vbcast.lane.b32.xlu0 %v3363_v29, 256 }
  0xe4   :  { %2654 = vmatmul.mubr.msk.bf16.gmra.mrb[4].mxu0 %vm2306_vm11, %v3193_v43  ;;  %vm328_vm12 = vcmp.eq.s32.totalorder %v3396_v37, %v294_v50  ;;  %vm327_vm13 = vcmp.eq.s32.totalorder %v3396_v37, %v290_v51  ;;  %v1065_v50 = vld [vmem:[#allocation9 + $0x30] sm:$0xff]  ;;  %v1066_v51 = vld [vmem:[#allocation9 + $0x38] sm:$0xff] }
  0xe5   :  { %2670 = vmatpush3.bf16.msra.mxu0 %v3030_v46  ;;  %vm2308_vm14 = vmpackc.low %vm328_vm12, %vm327_vm13  ;;  %1199 = vbcast.lane.b32.xlu1 %v3369_v30, 264  ;;  %v2899_v46 = vpack.c.bf16 %v1062_v45, %v1061_v44 }
  0xe6   :  { %2657 = vmatprep.mubr.msk.bf16.mxu0 %vm2308_vm14, %v3193_v43  ;;  %2671 = vmatprep.subr.bf16.mxu0 %v3031_v49 }
  0xe7   :  { %v302_v53 = vpop.permute.xlu1 %301  ;;  %v298_v54 = vpop.permute.xlu0 %297  ;;  %1195 = vbcast.lane.b32.xlu0 %v3369_v30, 256 }
  0xe8   :  { %vm330_vm15 = vcmp.eq.s32.totalorder %v3396_v37, %v302_v53  ;;  %vm329_vm0 = vcmp.eq.s32.totalorder %v3396_v37, %v298_v54  ;;  %v1067_v53 = vld [vmem:[#allocation9 + $0x40] sm:$0xff]  ;;  %v1068_v54 = vld [vmem:[#allocation9 + $0x48] sm:$0xff] }
  0xe9   :  { %2672 = vmatpush3.bf16.msra.mxu0 %v3031_v49  ;;  %vm2310_vm1 = vmpackc.low %vm330_vm15, %vm329_vm0  ;;  %1210 = vbcast.lane.b32.xlu1 %v3375_v31, 264  ;;  %v2902_v49 = vpack.c.bf16 %v1064_v48, %v1063_v47 }
  0xea   :  { %2673 = vmatprep.subr.bf16.mxu0 %v3032_v52 }
  0xeb   :  { %v310_v56 = vpop.permute.xlu1 %309  ;;  %v306_v57 = vpop.permute.xlu0 %305  ;;  %1206 = vbcast.lane.b32.xlu0 %v3375_v31, 256 }
  0xec   :  { %2658 = vmatmul.mubr.msk.bf16.gmra.mrb[8].mxu0 %vm2310_vm1, %v3193_v43  ;;  %vm332_vm2 = vcmp.eq.s32.totalorder %v3396_v37, %v310_v56  ;;  %vm331_vm3 = vcmp.eq.s32.totalorder %v3396_v37, %v306_v57  ;;  %v1069_v56 = vld [vmem:[#allocation9 + $0x50] sm:$0xff]  ;;  %v1070_v57 = vld [vmem:[#allocation9 + $0x58] sm:$0xff] }
  0xed   :  { %2674 = vmatpush3.bf16.msra.mxu0 %v3032_v52  ;;  %vm2312_vm4 = vmpackc.low %vm332_vm2, %vm331_vm3  ;;  %1221 = vbcast.lane.b32.xlu1 %v3381_v32, 264  ;;  %v2905_v52 = vpack.c.bf16 %v1066_v51, %v1065_v50 }
  0xee   :  { %2661 = vmatprep.mubr.msk.bf16.mxu0 %vm2312_vm4, %v3193_v43  ;;  %2675 = vmatprep.subr.bf16.mxu0 %v3033_v55 }
  0xef   :  { %v318_v59 = vpop.permute.xlu1 %317  ;;  %v314_v60 = vpop.permute.xlu0 %313  ;;  %1217 = vbcast.lane.b32.xlu0 %v3381_v32, 256 }
  0xf0   :  { %vm334_vm5 = vcmp.eq.s32.totalorder %v3396_v37, %v318_v59  ;;  %vm333_vm6 = vcmp.eq.s32.totalorder %v3396_v37, %v314_v60  ;;  %v1071_v59 = vld [vmem:[#allocation9 + $0x60] sm:$0xff]  ;;  %v1072_v60 = vld [vmem:[#allocation9 + $0x68] sm:$0xff] }
  0xf1   :  { %2676 = vmatpush3.bf16.msra.mxu0 %v3033_v55  ;;  %vm2314_vm7 = vmpackc.low %vm334_vm5, %vm333_vm6  ;;  %1232 = vbcast.lane.b32.xlu1 %v3387_v33, 264  ;;  %v2908_v55 = vpack.c.bf16 %v1068_v54, %v1067_v53 }
  0xf2   :  { %2677 = vmatprep.subr.bf16.mxu0 %v3034_v58 }
  0xf3   :  { %v105_v62 = vpop.permute.xlu1 %104  ;;  %v101_v63 = vpop.permute.xlu0 %100  ;;  %1228 = vbcast.lane.b32.xlu0 %v3387_v33, 256 }
  0xf4   :  { %2662 = vmatmul.mubr.msk.bf16.gmra.mrb[12].mxu0 %vm2314_vm7, %v3193_v43  ;;  %vm184_vm8 = vcmp.eq.s32.totalorder %v3396_v37, %v105_v62  ;;  %vm183_vm9 = vcmp.eq.s32.totalorder %v3396_v37, %v101_v63  ;;  %v1073_v62 = vld [vmem:[#allocation9 + $0x70] sm:$0xff]  ;;  %v1074_v63 = vld [vmem:[#allocation9 + $0x78] sm:$0xff] }
  0xf5   :  { %2678 = vmatpush3.bf16.msra.mxu0 %v3034_v58  ;;  %vm2324_vm10 = vmpackc.low %vm184_vm8, %vm183_vm9  ;;  %1243 = vbcast.lane.b32.xlu1 %v3393_v34, 264  ;;  %v2911_v58 = vpack.c.bf16 %v1070_v57, %v1069_v56 }
  0xf6   :  { %2679 = vmatprep.subr.bf16.mxu0 %v3035_v61  ;;  %2681 = vmatprep.mubr.msk.bf16.mxu0 %vm2324_vm10, %v3193_v43 }
  0xf7   :  { %v116_v1 = vpop.permute.xlu1 %115  ;;  %v112_v2 = vpop.permute.xlu0 %111  ;;  %1239 = vbcast.lane.b32.xlu0 %v3393_v34, 256 }
  0xf8   :  { %vm186_vm11 = vcmp.eq.s32.totalorder %v3396_v37, %v116_v1  ;;  %vm185_vm12 = vcmp.eq.s32.totalorder %v3396_v37, %v112_v2  ;;  %v3517_v1 = vld [vmem:[#allocation6] sm:$0xff]   ;;  %v3196_v2 = vmov 0.0  }
  0xf9   :  { %2680 = vmatpush3.bf16.msra.mxu0 %v3035_v61  ;;  %vm2326_vm13 = vmpackc.low %vm186_vm11, %vm185_vm12  ;;  %1254 = vbcast.lane.b32.xlu1 %v3402_v38, 264  ;;  %v2914_v61 = vpack.c.bf16 %v1072_v60, %v1071_v59 }
  0xfa   :  { %2697 = vmatprep.subr.bf16.mxu0 %v3036_v0 }
  0xfb   :  { %v127_v4 = vpop.permute.xlu1 %126  ;;  %v123_v5 = vpop.permute.xlu0 %122  ;;  %1250 = vbcast.lane.b32.xlu0 %v3402_v38, 256 }
  0xfc   :  { %2682 = vmatmul.mubr.msk.bf16.vlgmr.msra.gmra.mrb[0].mxu0 %vm2326_vm13, %v3193_v43  ;;  %vm188_vm14 = vcmp.eq.s32.totalorder %v3396_v37, %v127_v4  ;;  %vm187_vm15 = vcmp.eq.s32.totalorder %v3396_v37, %v123_v5 }
  0xfd   :  { %2698 = vmatpush3.bf16.msra.mxu0 %v3036_v0  ;;  %vm2328_vm0 = vmpackc.low %vm188_vm14, %vm187_vm15  ;;  %1265 = vbcast.lane.b32.xlu1 %v3412_v41, 264  ;;  %v2917_v0 = vpack.c.bf16 %v1074_v63, %v1073_v62 }
  0xfe   :  { %2685 = vmatprep.mubr.msk.bf16.mxu0 %vm2328_vm0, %v3193_v43  ;;  %2699 = vmatprep.subr.bf16.mxu0 %v3037_v3 }
  0xff   :  { %v138_v7 = vpop.permute.xlu1 %137  ;;  %v134_v8 = vpop.permute.xlu0 %133  ;;  %1261 = vbcast.lane.b32.xlu0 %v3412_v41, 256 }
 0x100   :  { %vm190_vm1 = vcmp.eq.s32.totalorder %v3396_v37, %v138_v7  ;;  %vm189_vm2 = vcmp.eq.s32.totalorder %v3396_v37, %v134_v8 }
 0x101   :  { %2700 = vmatpush3.bf16.msra.mxu0 %v3037_v3  ;;  %vm2330_vm3 = vmpackc.low %vm190_vm1, %vm189_vm2  ;;  %1771 = vbcast.lane.b32.xlu1 %v3363_v29, 266 }
 0x102   :  { %2701 = vmatprep.subr.bf16.mxu0 %v3038_v6 }
 0x103   :  { %v149_v10 = vpop.permute.xlu1 %148  ;;  %v145_v11 = vpop.permute.xlu0 %144  ;;  %1767 = vbcast.lane.b32.xlu0 %v3363_v29, 258 }
 0x104   :  { %2686 = vmatmul.mubr.msk.bf16.gmra.mrb[4].mxu0 %vm2330_vm3, %v3193_v43  ;;  %vm192_vm4 = vcmp.eq.s32.totalorder %v3396_v37, %v149_v10  ;;  %vm191_vm5 = vcmp.eq.s32.totalorder %v3396_v37, %v145_v11 }
 0x105   :  { %2702 = vmatpush3.bf16.msra.mxu0 %v3038_v6  ;;  %vm2332_vm6 = vmpackc.low %vm192_vm4, %vm191_vm5  ;;  %1779 = vbcast.lane.b32.xlu1 %v3369_v30, 266 }
 0x106   :  { %2689 = vmatprep.mubr.msk.bf16.mxu0 %vm2332_vm6, %v3193_v43  ;;  %2703 = vmatprep.subr.bf16.mxu0 %v3039_v9 }
 0x107   :  { %v160_v13 = vpop.permute.xlu1 %159  ;;  %v156_v14 = vpop.permute.xlu0 %155  ;;  %1775 = vbcast.lane.b32.xlu0 %v3369_v30, 258 }
 0x108   :  { %vm194_vm7 = vcmp.eq.s32.totalorder %v3396_v37, %v160_v13  ;;  %vm193_vm8 = vcmp.eq.s32.totalorder %v3396_v37, %v156_v14 }
 0x109   :  { %2704 = vmatpush3.bf16.msra.mxu0 %v3039_v9  ;;  %vm2334_vm9 = vmpackc.low %vm194_vm7, %vm193_vm8  ;;  %1787 = vbcast.lane.b32.xlu1 %v3375_v31, 266 }
 0x10a   :  { %2705 = vmatprep.subr.bf16.mxu0 %v3040_v12 }
 0x10b   :  { %v171_v16 = vpop.permute.xlu1 %170  ;;  %v167_v17 = vpop.permute.xlu0 %166  ;;  %1783 = vbcast.lane.b32.xlu0 %v3375_v31, 258 }
 0x10c   :  { %2690 = vmatmul.mubr.msk.bf16.gmra.mrb[8].mxu0 %vm2334_vm9, %v3193_v43  ;;  %vm196_vm10 = vcmp.eq.s32.totalorder %v3396_v37, %v171_v16  ;;  %vm195_vm11 = vcmp.eq.s32.totalorder %v3396_v37, %v167_v17 }
 0x10d   :  { %2706 = vmatpush3.bf16.msra.mxu0 %v3040_v12  ;;  %vm2336_vm12 = vmpackc.low %vm196_vm10, %vm195_vm11  ;;  %1795 = vbcast.lane.b32.xlu1 %v3381_v32, 266 }
 0x10e   :  { %2693 = vmatprep.mubr.msk.bf16.mxu0 %vm2336_vm12, %v3193_v43  ;;  %2707 = vmatprep.subr.bf16.mxu0 %v3041_v15 }
 0x10f   :  { %v182_v19 = vpop.permute.xlu1 %181  ;;  %v178_v20 = vpop.permute.xlu0 %177  ;;  %1791 = vbcast.lane.b32.xlu0 %v3381_v32, 258 }
 0x110   :  { %vm198_vm13 = vcmp.eq.s32.totalorder %v3396_v37, %v182_v19  ;;  %vm197_vm14 = vcmp.eq.s32.totalorder %v3396_v37, %v178_v20 }
 0x111   :  { %2708 = vmatpush3.bf16.msra.mxu0 %v3041_v15  ;;  %vm2338_vm15 = vmpackc.low %vm198_vm13, %vm197_vm14  ;;  %1803 = vbcast.lane.b32.xlu1 %v3387_v33, 266 }
 0x112   :  { %2709 = vmatprep.subr.bf16.mxu0 %v3042_v18 }
 0x113   :  { %v688_v22 = vpop.permute.xlu1 %687  ;;  %v684_v23 = vpop.permute.xlu0 %683  ;;  %1799 = vbcast.lane.b32.xlu0 %v3387_v33, 258 }
 0x114   :  { %2694 = vmatmul.mubr.msk.bf16.gmra.mrb[12].mxu0 %vm2338_vm15, %v3193_v43  ;;  %vm746_vm0 = vcmp.eq.s32.totalorder %v3396_v37, %v688_v22  ;;  %vm745_vm1 = vcmp.eq.s32.totalorder %v3396_v37, %v684_v23 }
 0x115   :  { %2710 = vmatpush3.bf16.msra.mxu0 %v3042_v18  ;;  %vm2364_vm2 = vmpackc.low %vm746_vm0, %vm745_vm1  ;;  %1811 = vbcast.lane.b32.xlu1 %v3393_v34, 266 }
 0x116   :  { %2711 = vmatprep.subr.bf16.mxu0 %v3043_v21  ;;  %2713 = vmatprep.mubr.msk.bf16.mxu0 %vm2364_vm2, %v3193_v43 }
 0x117   :  { %v696_v24 = vpop.permute.xlu1 %695  ;;  %v692_v25 = vpop.permute.xlu0 %691  ;;  %1807 = vbcast.lane.b32.xlu0 %v3393_v34, 258 }
 0x118   :  { %vm748_vm3 = vcmp.eq.s32.totalorder %v3396_v37, %v696_v24  ;;  %vm747_vm4 = vcmp.eq.s32.totalorder %v3396_v37, %v692_v25 }
 0x119   :  { %2712 = vmatpush3.bf16.msra.mxu0 %v3043_v21  ;;  %vm2366_vm5 = vmpackc.low %vm748_vm3, %vm747_vm4  ;;  %1819 = vbcast.lane.b32.xlu1 %v3402_v38, 266 }
 0x11a   :  { %2919 = vmatprep.subr.bf16.mxu0 %v3194_v42 }
 0x11b   :  { %v704_v26 = vpop.permute.xlu1 %703  ;;  %v700_v27 = vpop.permute.xlu0 %699  ;;  %1815 = vbcast.lane.b32.xlu0 %v3402_v38, 258 }
 0x11c   :  { %2714 = vmatmul.mubr.msk.bf16.vlgmr.msra.gmra.mrb[0].mxu0 %vm2366_vm5, %v3193_v43  ;;  %vm750_vm6 = vcmp.eq.s32.totalorder %v3396_v37, %v704_v26  ;;  %vm749_vm7 = vcmp.eq.s32.totalorder %v3396_v37, %v700_v27 }
 0x11d   :  { %vm2368_vm8 = vmpackc.low %vm750_vm6, %vm749_vm7  ;;  %1827 = vbcast.lane.b32.xlu1 %v3412_v41, 266 }
 0x11e   :  { %2717 = vmatprep.mubr.msk.bf16.mxu0 %vm2368_vm8, %v3193_v43  ;;  %vm3195_vm8 = vmmov 0  }
 0x11f   :  { %v712_v28 = vpop.permute.xlu1 %711  ;;  %v708_v29 = vpop.permute.xlu0 %707  ;;  %1823 = vbcast.lane.b32.xlu0 %v3412_v41, 258  ;;  %v2896_v41 = vpack.c.bf16 %v1060_v40, %v1059_v39  ;;  %2761 = vmatprep.mubr.msk.f32.mxu1 %vm3195_vm8, %v3196_v2 }
 0x120   :  { %vm752_vm9 = vcmp.eq.s32.totalorder %v3396_v37, %v712_v28  ;;  %vm751_vm10 = vcmp.eq.s32.totalorder %v3396_v37, %v708_v29 }
 0x121   :  { %vm2370_vm11 = vmpackc.low %vm752_vm9, %vm751_vm10  ;;  %2897 = vmatpush3.bf16.msra.mxu1 %v2896_v41  ;;  %2921 = vmatpush3.bf16.msra.mxu0 %v2896_v41  ;;  %vm994_vm9 = vcmask 1045504   ;;  %vm1090_vm10 = vcmask 1041409  }
 0x122   :  { %2898 = vmatprep.subr.bf16.mxu1 %v3194_v42  ;;  %2922 = vmatprep.subr.bf16.mxu0 %v3194_v42 }
 0x123   :  { %v720_v30 = vpop.permute.xlu1 %719  ;;  %v716_v31 = vpop.permute.xlu0 %715 }
 0x124   :  { %2718 = vmatmul.mubr.msk.bf16.gmra.mrb[4].mxu0 %vm2370_vm11, %v3193_v43  ;;  %vm754_vm12 = vcmp.eq.s32.totalorder %v3396_v37, %v720_v30  ;;  %vm753_vm13 = vcmp.eq.s32.totalorder %v3396_v37, %v716_v31  ;;  %vm1092_vm11 = vcmask 1042434  }
 0x125   :  { %vm2372_vm14 = vmpackc.low %vm754_vm12, %vm753_vm13  ;;  %2900 = vmatpush3.bf16.msra.mxu1 %v2899_v46  ;;  %2924 = vmatpush3.bf16.msra.mxu0 %v2899_v46  ;;  %vm1094_vm12 = vcmask 1043459   ;;  %vm3714_vm13 = vcmask 1044484  }
 0x126   :  { %2721 = vmatprep.mubr.msk.bf16.mxu0 %vm2372_vm14, %v3193_v43  ;;  %2901 = vmatprep.subr.bf16.mxu1 %v3194_v42  ;;  %vm3713_vm14 = vcmask 1045509  }
 0x127   :  { %v728_v32 = vpop.permute.xlu1 %727  ;;  %v724_v33 = vpop.permute.xlu0 %723  ;;  %2925 = vmatprep.subr.bf16.mxu0 %v3194_v42 }
 0x128   :  { %vm756_vm15 = vcmp.eq.s32.totalorder %v3396_v37, %v728_v32  ;;  %vm755_vm0 = vcmp.eq.s32.totalorder %v3396_v37, %v724_v33 }
 0x129   :  { %vm2374_vm1 = vmpackc.low %vm756_vm15, %vm755_vm0  ;;  %2903 = vmatpush3.bf16.msra.mxu1 %v2902_v49  ;;  %2927 = vmatpush3.bf16.msra.mxu0 %v2902_v49  ;;  %vm3712_vm15 = vcmask 1046534  }
 0x12a   :  { %2904 = vmatprep.subr.bf16.mxu1 %v3194_v42  ;;  %2928 = vmatprep.subr.bf16.mxu0 %v3194_v42 }
 0x12b   :  { %v736_v34 = vpop.permute.xlu1 %735  ;;  %v732_v35 = vpop.permute.xlu0 %731 }
 0x12c   :  { %2722 = vmatmul.mubr.msk.bf16.gmra.mrb[8].mxu0 %vm2374_vm1, %v3193_v43  ;;  %vm758_vm2 = vcmp.eq.s32.totalorder %v3396_v37, %v736_v34  ;;  %vm757_vm3 = vcmp.eq.s32.totalorder %v3396_v37, %v732_v35 }
 0x12d   :  { %vm2376_vm4 = vmpackc.low %vm758_vm2, %vm757_vm3  ;;  %2906 = vmatpush3.bf16.msra.mxu1 %v2905_v52  ;;  %2930 = vmatpush3.bf16.msra.mxu0 %v2905_v52  ;;  %vm3711_vm2 = vcmask 1047559  }
 0x12e   :  { %2725 = vmatprep.mubr.msk.bf16.mxu0 %vm2376_vm4, %v3193_v43  ;;  %2907 = vmatprep.subr.bf16.mxu1 %v3194_v42 }
 0x12f   :  { %v744_v36 = vpop.permute.xlu1 %743  ;;  %v740_v38 = vpop.permute.xlu0 %739  ;;  %2931 = vmatprep.subr.bf16.mxu0 %v3194_v42 }
 0x130   :  { %vm760_vm5 = vcmp.eq.s32.totalorder %v3396_v37, %v744_v36  ;;  %vm759_vm6 = vcmp.eq.s32.totalorder %v3396_v37, %v740_v38 }
 0x131   :  { %vm2378_vm7 = vmpackc.low %vm760_vm5, %vm759_vm6  ;;  %2909 = vmatpush3.bf16.msra.mxu1 %v2908_v55  ;;  %2933 = vmatpush3.bf16.msra.mxu0 %v2908_v55 }
 0x132   :  { %2910 = vmatprep.subr.bf16.mxu1 %v3194_v42  ;;  %2934 = vmatprep.subr.bf16.mxu0 %v3194_v42 }
 0x133   :  { %v3524_v46 = vpop.permute.xlu1 %1345  ;;  %v3526_v51 = vpop.permute.xlu0 %1341 }
 0x134   :  { %2726 = vmatmul.mubr.msk.bf16.gmra.mrb[12].mxu0 %vm2378_vm7, %v3193_v43  ;;  %vm1404_vm0 = vcmp.eq.s32.totalorder %v3396_v37, %v3524_v46  ;;  %vm1403_vm1 = vcmp.eq.s32.totalorder %v3396_v37, %v3526_v51  ;;  %v3046_v46 = vld [vmem:[#allocation6 + $0x10] sm:$0xff]  }
 0x135   :  { %2912 = vmatpush3.bf16.msra.mxu1 %v2911_v58  ;;  %2936 = vmatpush3.bf16.msra.mxu0 %v2911_v58  ;;  %vm2421_vm3 = vmpackc.low %vm1404_vm0, %vm1403_vm1 }
 0x136   :  { %2913 = vmatprep.subr.bf16.mxu1 %v3194_v42  ;;  %2937 = vmatprep.subr.bf16.mxu0 %v3194_v42 }
 0x137   :  { %2892 = vmatprep.mubr.msk.f32.mxu0 %vm3195_vm8, %v3196_v2 }
 0x139   :  { %2915 = vmatpush3.bf16.msra.mxu1 %v2914_v61  ;;  %2939 = vmatpush3.bf16.msra.mxu0 %v2914_v61 }
 0x13a   :  { %2916 = vmatprep.subr.bf16.mxu1 %v3194_v42  ;;  %2940 = vmatprep.subr.bf16.mxu0 %v3194_v42 }
 0x13d   :  { %2918 = vmatpush3.bf16.msra.mxu1 %v2917_v0  ;;  %2942 = vmatpush3.bf16.msra.mxu0 %v2917_v0 }
 0x13e   :  { %2764 = vmatprep.subr.bf16.mxu1 %v3517_v1 }
 0x1ef   :  { %v2715_v3 = vpop.f32.mrb[0].mxu0 }
 0x1f0   :  { %v899_v4 = vpop.f32.mrb[1].mxu0  ;;  %v980_v8 = vmax.f32 %v2715_v3, 0.0 }
 0x1f1   :  { %v2716_v5 = vpop.f32.mrb[2].mxu0  ;;  %v978_v10 = vmax.f32 %v899_v4, 0.0  ;;  %v3531_v4 = vpop.permute.xlu1 %1353 }
 0x1f2   :  { %v981_v6 = vmax.f32 %v2716_v5, 0.0  ;;  %v902_v7 = vpop.f32.mrb[3].mxu0  ;;  %vm1406_vm4 = vcmp.eq.s32.totalorder %v3396_v37, %v3531_v4 }
 0x1f3   :  { %v979_v9 = vmax.f32 %v902_v7, 0.0 }
 0x1f4   :  { %v1003_v11 = vsel %vm994_vm9, %v981_v6, -inf }
 0x1f5   :  { %v1004_v12 = vmax.f32 %v980_v8, %v1003_v11  ;;  %v995_v13 = vsel %vm994_vm9, %v979_v9, -inf  ;;  %v3533_v8 = vpop.permute.xlu0 %1349 }
 0x1f6   :  { %v996_v14 = vmax.f32 %v978_v10, %v995_v13  ;;  %vm1405_vm5 = vcmp.eq.s32.totalorder %v3396_v37, %v3533_v8 }
 0x1f7   :  { %v1005_v15 = vrot.slane %v1004_v12, 4  ;;  %v2719_v16 = vpop.f32.mrb[4].mxu0  ;;  %vm2423_vm8 = vmpackc.low %vm1406_vm4, %vm1405_vm5 }
 0x1f8   :  { %v997_v17 = vrot.slane %v996_v14, 4  ;;  %v915_v18 = vpop.f32.mrb[5].mxu0  ;;  %v984_v25 = vmax.f32 %v2719_v16, 0.0 }
 0x1f9   :  { %v1006_v19 = vmax.f32 %v1004_v12, %v1005_v15  ;;  %v2720_v20 = vpop.f32.mrb[6].mxu0  ;;  %v982_v28 = vmax.f32 %v915_v18, 0.0 }
 0x1fa   :  { %v998_v21 = vmax.f32 %v996_v14, %v997_v17  ;;  %v985_v22 = vmax.f32 %v2720_v20, 0.0  ;;  %v918_v23 = vpop.f32.mrb[7].mxu0 }
 0x1fb   :  { %v1007_v24 = vrot.slane %v1006_v19, 2  ;;  %v983_v26 = vmax.f32 %v918_v23, 0.0 }
 0x1fc   :  { %v999_v27 = vrot.slane %v998_v21, 2  ;;  %v1019_v29 = vsel %vm994_vm9, %v985_v22, -inf }
 0x1fd   :  { %v1008_v30 = vmax.f32 %v1006_v19, %v1007_v24  ;;  %v1020_v31 = vmax.f32 %v984_v25, %v1019_v29  ;;  %v1011_v32 = vsel %vm994_vm9, %v983_v26, -inf  ;;  %v3539_v29 = vpop.permute.xlu1 %1361 }
 0x1fe   :  { %v1000_v33 = vmax.f32 %v998_v21, %v999_v27  ;;  %v1012_v34 = vmax.f32 %v982_v28, %v1011_v32  ;;  %vm1408_vm6 = vcmp.eq.s32.totalorder %v3396_v37, %v3539_v29  ;;  %v3061_v29 = vld [vmem:[#allocation7 + $0x8] sm:$0xff]  }
 0x1ff   :  { %v1009_v35 = vrot.slane %v1008_v30, 1  ;;  %v1021_v36 = vrot.slane %v1020_v31, 4  ;;  %v2723_v38 = vpop.f32.mrb[8].mxu0 }
 0x200   :  { %v1001_v39 = vrot.slane %v1000_v33, 1  ;;  %v1013_v40 = vrot.slane %v1012_v34, 4  ;;  %v931_v41 = vpop.f32.mrb[9].mxu0  ;;  %v988_v53 = vmax.f32 %v2723_v38, 0.0 }
 0x201   :  { %v1010_v42 = vmax.f32 %v1008_v30, %v1009_v35  ;;  %v1022_v44 = vmax.f32 %v1020_v31, %v1021_v36  ;;  %v2724_v45 = vpop.f32.mrb[10].mxu0  ;;  %v986_v57 = vmax.f32 %v931_v41, 0.0  ;;  %v3541_v30 = vpop.permute.xlu0 %1357 }
 0x202   :  { %v1002_v47 = vmax.f32 %v1000_v33, %v1001_v39  ;;  %v1014_v48 = vmax.f32 %v1012_v34, %v1013_v40  ;;  %v989_v49 = vmax.f32 %v2724_v45, 0.0  ;;  %v934_v50 = vpop.f32.mrb[11].mxu0  ;;  %vm1407_vm7 = vcmp.eq.s32.totalorder %v3396_v37, %v3541_v30 }
 0x203   :  { %v1023_v52 = vrot.slane %v1022_v44, 2  ;;  %v987_v54 = vmax.f32 %v934_v50, 0.0  ;;  %vm2425_vm0 = vmpackc.low %vm1408_vm6, %vm1407_vm7 }
 0x204   :  { %v1091_v55 = vsel %vm1090_vm10, %v1010_v42, %v1002_v47  ;;  %v1015_v56 = vrot.slane %v1014_v48, 2  ;;  %v1035_v58 = vsel %vm994_vm9, %v989_v49, -inf }
 0x205   :  { %v1024_v59 = vmax.f32 %v1022_v44, %v1023_v52  ;;  %v1036_v60 = vmax.f32 %v988_v53, %v1035_v58  ;;  %v1027_v61 = vsel %vm994_vm9, %v987_v54, -inf  ;;  %v3544_v44 = vpop.permute.xlu1 %1369  ;;  %v3546_v45 = vpop.permute.xlu0 %1365  ;;  %v3045_v58 = vld [vmem:[#allocation6 + $0x8] sm:$0xff]  }
 0x206   :  { %v1016_v62 = vmax.f32 %v1014_v48, %v1015_v56  ;;  %v1028_v63 = vmax.f32 %v986_v57, %v1027_v61  ;;  %v3047_v61 = vld [vmem:[#allocation6 + $0x18] sm:$0xff]   ;;  %vm1410_vm1 = vcmp.eq.s32.totalorder %v3396_v37, %v3544_v44  ;;  %v3066_v44 = vld [vmem:[#allocation7 + $0x30] sm:$0xff]  }
 0x207   :  { %v1025_v0 = vrot.slane %v1024_v59, 1  ;;  %v1037_v2 = vrot.slane %v1036_v60, 4  ;;  %v2727_v3 = vpop.f32.mrb[12].mxu0 }
 0x208   :  { %v1017_v5 = vrot.slane %v1016_v62, 1  ;;  %v1029_v6 = vrot.slane %v1028_v63, 4  ;;  %v947_v7 = vpop.f32.mrb[13].mxu0  ;;  %v992_v17 = vmax.f32 %v2727_v3, 0.0 }
 0x209   :  { %v1038_v9 = vmax.f32 %v1036_v60, %v1037_v2  ;;  %v2728_v10 = vpop.f32.mrb[14].mxu0  ;;  %v1026_v15 = vmax.f32 %v1024_v59, %v1025_v0  ;;  %v990_v20 = vmax.f32 %v947_v7, 0.0  ;;  %v3553_v54 = vpop.permute.xlu1 %1377  ;;  %v3048_v0 = vld [vmem:[#allocation6 + $0x20] sm:$0xff]  }
 0x20a   :  { %v1018_v11 = vmax.f32 %v1016_v62, %v1017_v5  ;;  %v1030_v12 = vmax.f32 %v1028_v63, %v1029_v6  ;;  %v993_v13 = vmax.f32 %v2728_v10, 0.0  ;;  %v950_v14 = vpop.f32.mrb[15].mxu0  ;;  %v3050_v5 = vld [vmem:[#allocation6 + $0x30] sm:$0xff]   ;;  %v3052_v10 = vld [vmem:[#allocation4] sm:$0xff]   ;;  %vm1412_vm4 = vcmp.eq.s32.totalorder %v3396_v37, %v3553_v54 }
 0x20b   :  { %v1039_v16 = vrot.slane %v1038_v9, 2  ;;  %v991_v18 = vmax.f32 %v950_v14, 0.0  ;;  %v3054_v14 = vld [vmem:[#allocation4 + $0x10] sm:$0xff]  }
 0x20c   :  { %v1031_v19 = vrot.slane %v1030_v12, 2  ;;  %v1051_v21 = vsel %vm994_vm9, %v993_v13, -inf  ;;  %v1093_v22 = vsel %vm1092_vm11, %v1018_v11, %v1091_v55  ;;  %v1374_v55 = vpop.permute.xlu0 %1373  ;;  %v3053_v13 = vld [vmem:[#allocation4 + $0x8] sm:$0xff]  }
 0x20d   :  { %v1040_v23 = vmax.f32 %v1038_v9, %v1039_v16  ;;  %v1052_v24 = vmax.f32 %v992_v17, %v1051_v21  ;;  %v1043_v25 = vsel %vm994_vm9, %v991_v18, -inf  ;;  %v1095_v26 = vsel %vm1094_vm12, %v1026_v15, %v1093_v22  ;;  %v3559_v51 = vpop.permute.xlu1 %1385  ;;  %v3051_v9 = vld [vmem:[#allocation6 + $0x38] sm:$0xff]   ;;  %v3056_v18 = vld [vmem:[#allocation4 + $0x20] sm:$0xff]   ;;  %v3057_v21 = vld [vmem:[#allocation4 + $0x28] sm:$0xff]  }
 0x20e   :  { %v1032_v27 = vmax.f32 %v1030_v12, %v1031_v19  ;;  %v1044_v28 = vmax.f32 %v990_v20, %v1043_v25  ;;  %vm1411_vm5 = vcmp.eq.s32.totalorder %v3396_v37, %v1374_v55  ;;  %v3055_v15 = vld [vmem:[#allocation4 + $0x18] sm:$0xff]   ;;  %v3058_v22 = vld [vmem:[#allocation4 + $0x30] sm:$0xff]  }
 0x20f   :  { %v1041_v31 = vrot.slane %v1040_v23, 1  ;;  %v1053_v32 = vrot.slane %v1052_v24, 4  ;;  %vm2429_vm7 = vmpackc.low %vm1412_vm4, %vm1411_vm5  ;;  %v3059_v25 = vld [vmem:[#allocation4 + $0x38] sm:$0xff]  }
 0x210   :  { %v1033_v33 = vrot.slane %v1032_v27, 1  ;;  %v1045_v34 = vrot.slane %v1044_v28, 4  ;;  %v3561_v60 = vpop.permute.xlu0 %1381 }
 0x211   :  { %v1054_v35 = vmax.f32 %v1052_v24, %v1053_v32  ;;  %v1042_v39 = vmax.f32 %v1040_v23, %v1041_v31  ;;  %v3563_v62 = vpop.permute.xlu1 %1393  ;;  %v3062_v32 = vld [vmem:[#allocation7 + $0x10] sm:$0xff]  }
 0x212   :  { %v1034_v36 = vmax.f32 %v1032_v27, %v1033_v33  ;;  %v1046_v38 = vmax.f32 %v1044_v28, %v1045_v34  ;;  %v3060_v28 = vld [vmem:[#allocation7] sm:$0xff]  }
 0x213   :  { %v1055_v40 = vrot.slane %v1054_v35, 2 }
 0x214   :  { %v1047_v41 = vrot.slane %v1046_v38, 2  ;;  %v1097_v42 = vsel %vm3714_vm13, %v1034_v36, %v1095_v26  ;;  %v3565_v63 = vpop.permute.xlu0 %1389  ;;  %v3064_v36 = vld [vmem:[#allocation7 + $0x20] sm:$0xff]  }
 0x215   :  { %v1056_v47 = vmax.f32 %v1054_v35, %v1055_v40  ;;  %v1099_v48 = vsel %vm3713_vm14, %v1042_v39, %v1097_v42  ;;  %v3567_v2 = vpop.permute.xlu1 %1401  ;;  %v3063_v35 = vld [vmem:[#allocation7 + $0x18] sm:$0xff]   ;;  %v3065_v40 = vld [vmem:[#allocation7 + $0x28] sm:$0xff]  }
 0x216   :  { %v1048_v49 = vmax.f32 %v1046_v38, %v1047_v41 }
 0x217   :  { %v1057_v50 = vrot.slane %v1056_v47, 1 }
 0x218   :  { %v1049_v52 = vrot.slane %v1048_v49, 1  ;;  %v3569_v3 = vpop.permute.xlu0 %1397 }
 0x219   :  { %v1058_v56 = vmax.f32 %v1056_v47, %v1057_v50  ;;  %v3571_v6 = vpop.permute.xlu1 %1188 }
 0x21a   :  { %v1050_v53 = vmax.f32 %v1048_v49, %v1049_v52 }
 0x21c   :  { %v1101_v57 = vsel %vm3712_vm15, %v1050_v53, %v1099_v48  ;;  %v3573_v7 = vpop.permute.xlu0 %1184 }
 0x21d   :  { %v1103_v59 = vsel %vm3711_vm2, %v1058_v56, %v1101_v57  ;;  %v3579_v11 = vpop.permute.xlu1 %1199 }
 0x21e   :  { %2762 = vmatmul.mubr.f32.vlgmr.msra.gmra.mrb[0].mxu1 %v1103_v59 }
 0x21f   :  { %2765 = vmatpush3.bf16.msra.mxu1 %v3517_v1  ;;  %2780 = vmatprep.mubr.msk.bf16.mxu1 %vm2421_vm3, %v3193_v43  ;;  %v3049_v1 = vld [vmem:[#allocation6 + $0x28] sm:$0xff]   ;;  %vm1409_vm3 = vcmp.eq.s32.totalorder %v3396_v37, %v3546_v45  ;;  %v3067_v45 = vld [vmem:[#allocation7 + $0x38] sm:$0xff]  }
 0x220   :  { %2766 = vmatprep.subr.bf16.mxu1 %v3045_v58  ;;  %v3581_v12 = vpop.permute.xlu0 %1195  ;;  %vm2427_vm6 = vmpackc.low %vm1410_vm1, %vm1409_vm3  ;;  %vm1416_vm1 = vcmp.eq.s32.totalorder %v3396_v37, %v3563_v62  ;;  %vm1415_vm3 = vcmp.eq.s32.totalorder %v3396_v37, %v3565_v63 }
 0x221   :  { %v3588_v4 = vpop.permute.xlu1 %1210  ;;  %vm2433_vm5 = vmpackc.low %vm1416_vm1, %vm1415_vm3 }
 0x223   :  { %2767 = vmatpush3.bf16.msra.mxu1 %v3045_v58  ;;  %v3677_v58 = vld [vmem:[%s3709_s5] ss:$0 sm:$0xff] }
 0x224   :  { %2768 = vmatprep.subr.bf16.mxu1 %v3046_v46  ;;  %v1207_v8 = vpop.permute.xlu0 %1206 }
 0x225   :  { %v3598_v16 = vpop.permute.xlu1 %1221 }
 0x227   :  { %2769 = vmatpush3.bf16.msra.mxu1 %v3046_v46 }
 0x228   :  { %2770 = vmatprep.subr.bf16.mxu1 %v3047_v61  ;;  %v3600_v17 = vpop.permute.xlu0 %1217 }
 0x229   :  { %v1233_v19 = vpop.permute.xlu1 %1232 }
 0x22b   :  { %2771 = vmatpush3.bf16.msra.mxu1 %v3047_v61 }
 0x22c   :  { %2772 = vmatprep.subr.bf16.mxu1 %v3048_v0  ;;  %v1229_v20 = vpop.permute.xlu0 %1228 }
 0x22d   :  { %v1244_v23 = vpop.permute.xlu1 %1243 }
 0x22f   :  { %2773 = vmatpush3.bf16.msra.mxu1 %v3048_v0 }
 0x230   :  { %2774 = vmatprep.subr.bf16.mxu1 %v3049_v1  ;;  %v1240_v24 = vpop.permute.xlu0 %1239 }
 0x231   :  { %v1255_v26 = vpop.permute.xlu1 %1254 }
 0x232   :  { %vm1280_vm2 = vcmp.eq.s32.totalorder %v3396_v37, %v1255_v26 }
 0x233   :  { %2775 = vmatpush3.bf16.msra.mxu1 %v3049_v1 }
 0x234   :  { %2776 = vmatprep.subr.bf16.mxu1 %v3050_v5  ;;  %v1251_v27 = vpop.permute.xlu0 %1250 }
 0x235   :  { %v1266_v30 = vpop.permute.xlu1 %1265 }
 0x237   :  { %2777 = vmatpush3.bf16.msra.mxu1 %v3050_v5 }
 0x238   :  { %2778 = vmatprep.subr.bf16.mxu1 %v3051_v9  ;;  %v1262_v31 = vpop.permute.xlu0 %1261 }
 0x239   :  { %v1772_v33 = vpop.permute.xlu1 %1771 }
 0x23b   :  { %2779 = vmatpush3.bf16.msra.mxu1 %v3051_v9 }
 0x23c   :  { %2796 = vmatprep.subr.bf16.mxu1 %v3052_v10  ;;  %v1768_v34 = vpop.permute.xlu0 %1767 }
 0x23d   :  { %v1780_v38 = vpop.permute.xlu1 %1779 }
 0x23e   :  { %2781 = vmatmul.mubr.msk.bf16.vlgmr.msra.gmra.mrb[4].mxu1 %vm2423_vm8, %v3193_v43  ;;  %vm1414_vm8 = vcmp.eq.s32.totalorder %v3396_v37, %v3559_v51 }
 0x23f   :  { %2797 = vmatpush3.bf16.msra.mxu1 %v3052_v10  ;;  %2784 = vmatprep.mubr.msk.bf16.mxu1 %vm2425_vm0, %v3193_v43  ;;  %vm1413_vm0 = vcmp.eq.s32.totalorder %v3396_v37, %v3561_v60 }
 0x240   :  { %2798 = vmatprep.subr.bf16.mxu1 %v3053_v13  ;;  %vm2431_vm4 = vmpackc.low %vm1414_vm8, %vm1413_vm0  ;;  %vm1268_vm8 = vcmp.eq.s32.totalorder %v3396_v37, %v3571_v6  ;;  %vm1267_vm0 = vcmp.eq.s32.totalorder %v3396_v37, %v3573_v7  ;;  %v1776_v39 = vpop.permute.xlu0 %1775 }
 0x241   :  { %vm2445_vm3 = vmpackc.low %vm1268_vm8, %vm1267_vm0  ;;  %v1788_v41 = vpop.permute.xlu1 %1787 }
 0x243   :  { %2799 = vmatpush3.bf16.msra.mxu1 %v3053_v13 }
 0x244   :  { %2800 = vmatprep.subr.bf16.mxu1 %v3054_v14  ;;  %v1784_v42 = vpop.permute.xlu0 %1783 }
 0x245   :  { %v1796_v47 = vpop.permute.xlu1 %1795  ;;  %vm1833_vm15 = vcmp.eq.s32.totalorder %v3396_v37, %v1784_v42 }
 0x246   :  { %2785 = vmatmul.mubr.msk.bf16.gmra.mrb[8].mxu1 %vm2427_vm6, %v3193_v43  ;;  %vm1418_vm6 = vcmp.eq.s32.totalorder %v3396_v37, %v3567_v2 }
 0x247   :  { %2801 = vmatpush3.bf16.msra.mxu1 %v3054_v14  ;;  %2788 = vmatprep.mubr.msk.bf16.mxu1 %vm2429_vm7, %v3193_v43  ;;  %vm1417_vm7 = vcmp.eq.s32.totalorder %v3396_v37, %v3569_v3 }
 0x248   :  { %2802 = vmatprep.subr.bf16.mxu1 %v3055_v15  ;;  %vm2435_vm1 = vmpackc.low %vm1418_vm6, %vm1417_vm7  ;;  %vm1272_vm6 = vcmp.eq.s32.totalorder %v3396_v37, %v3588_v4  ;;  %vm1271_vm7 = vcmp.eq.s32.totalorder %v3396_v37, %v1207_v8  ;;  %v1792_v48 = vpop.permute.xlu0 %1791 }
 0x249   :  { %vm2449_vm0 = vmpackc.low %vm1272_vm6, %vm1271_vm7  ;;  %v1804_v49 = vpop.permute.xlu1 %1803 }
 0x24b   :  { %2803 = vmatpush3.bf16.msra.mxu1 %v3055_v15 }
 0x24c   :  { %2804 = vmatprep.subr.bf16.mxu1 %v3056_v18  ;;  %v1800_v50 = vpop.permute.xlu0 %1799 }
 0x24d   :  { %v1812_v52 = vpop.permute.xlu1 %1811 }
 0x24e   :  { %2789 = vmatmul.mubr.msk.bf16.gmra.mrb[12].mxu1 %vm2431_vm4, %v3193_v43  ;;  %vm1270_vm4 = vcmp.eq.s32.totalorder %v3396_v37, %v3579_v11 }
 0x24f   :  { %2805 = vmatpush3.bf16.msra.mxu1 %v3056_v18  ;;  %2792 = vmatprep.mubr.msk.bf16.mxu1 %vm2433_vm5, %v3193_v43  ;;  %vm1269_vm5 = vcmp.eq.s32.totalorder %v3396_v37, %v3581_v12 }
 0x250   :  { %2806 = vmatprep.subr.bf16.mxu1 %v3057_v21  ;;  %vm2447_vm8 = vmpackc.low %vm1270_vm4, %vm1269_vm5  ;;  %vm1276_vm4 = vcmp.eq.s32.totalorder %v3396_v37, %v1233_v19  ;;  %vm1275_vm5 = vcmp.eq.s32.totalorder %v3396_v37, %v1229_v20  ;;  %v1808_v53 = vpop.permute.xlu0 %1807 }
 0x251   :  { %vm2453_vm7 = vmpackc.low %vm1276_vm4, %vm1275_vm5  ;;  %vm1282_vm5 = vcmp.eq.s32.totalorder %v3396_v37, %v1266_v30  ;;  %v1820_v54 = vpop.permute.xlu1 %1819 }
 0x253   :  { %2807 = vmatpush3.bf16.msra.mxu1 %v3057_v21 }
 0x254   :  { %2808 = vmatprep.subr.bf16.mxu1 %v3058_v22  ;;  %v1816_v55 = vpop.permute.xlu0 %1815 }
 0x255   :  { %v1828_v56 = vpop.permute.xlu1 %1827 }
 0x256   :  { %2793 = vmatmul.mubr.msk.bf16.gmra.mrb[16].mxu1 %vm2435_vm1, %v3193_v43  ;;  %vm1274_vm1 = vcmp.eq.s32.totalorder %v3396_v37, %v3598_v16 }
 0x257   :  { %2809 = vmatpush3.bf16.msra.mxu1 %v3058_v22  ;;  %2812 = vmatprep.mubr.msk.bf16.mxu1 %vm2445_vm3, %v3193_v43  ;;  %vm1273_vm3 = vcmp.eq.s32.totalorder %v3396_v37, %v3600_v17 }
 0x258   :  { %2810 = vmatprep.subr.bf16.mxu1 %v3059_v25  ;;  %vm2451_vm6 = vmpackc.low %vm1274_vm1, %vm1273_vm3  ;;  %vm1279_vm1 = vcmp.eq.s32.totalorder %v3396_v37, %v1251_v27  ;;  %v1824_v57 = vpop.permute.xlu0 %1823 }
 0x259   :  { %vm2457_vm4 = vmpackc.low %vm1280_vm2, %vm1279_vm1  ;;  %vm1832_vm1 = vcmp.eq.s32.totalorder %v3396_v37, %v1780_v38 }
 0x25b   :  { %2811 = vmatpush3.bf16.msra.mxu1 %v3059_v25 }
 0x25c   :  { %2828 = vmatprep.subr.bf16.mxu1 %v3060_v28 }
 0x25e   :  { %2813 = vmatmul.mubr.msk.bf16.vlgmr.msra.gmra.mrb[4].mxu1 %vm2447_vm8, %v3193_v43  ;;  %vm1278_vm8 = vcmp.eq.s32.totalorder %v3396_v37, %v1244_v23 }
 0x25f   :  { %2829 = vmatpush3.bf16.msra.mxu1 %v3060_v28  ;;  %2816 = vmatprep.mubr.msk.bf16.mxu1 %vm2449_vm0, %v3193_v43  ;;  %vm1277_vm0 = vcmp.eq.s32.totalorder %v3396_v37, %v1240_v24 }
 0x260   :  { %2830 = vmatprep.subr.bf16.mxu1 %v3061_v29  ;;  %vm2455_vm3 = vmpackc.low %vm1278_vm8, %vm1277_vm0  ;;  %vm1829_vm8 = vcmp.eq.s32.totalorder %v3396_v37, %v1768_v34 }
 0x263   :  { %2831 = vmatpush3.bf16.msra.mxu1 %v3061_v29 }
 0x264   :  { %2832 = vmatprep.subr.bf16.mxu1 %v3062_v32 }
 0x266   :  { %2817 = vmatmul.mubr.msk.bf16.gmra.mrb[8].mxu1 %vm2451_vm6, %v3193_v43  ;;  %vm1281_vm6 = vcmp.eq.s32.totalorder %v3396_v37, %v1262_v31 }
 0x267   :  { %2833 = vmatpush3.bf16.msra.mxu1 %v3062_v32  ;;  %2820 = vmatprep.mubr.msk.bf16.mxu1 %vm2453_vm7, %v3193_v43  ;;  %vm1830_vm7 = vcmp.eq.s32.totalorder %v3396_v37, %v1772_v33  ;;  %vm2459_vm2 = vmpackc.low %vm1282_vm5, %vm1281_vm6 }
 0x268   :  { %2834 = vmatprep.subr.bf16.mxu1 %v3063_v35  ;;  %vm2485_vm0 = vmpackc.low %vm1830_vm7, %vm1829_vm8  ;;  %vm1836_vm7 = vcmp.eq.s32.totalorder %v3396_v37, %v1796_v47  ;;  %vm1835_vm8 = vcmp.eq.s32.totalorder %v3396_v37, %v1792_v48 }
 0x269   :  { %vm2491_vm14 = vmpackc.low %vm1836_vm7, %vm1835_vm8  ;;  %vm1175_vm8 = vcmask 64512  }
 0x26b   :  { %2835 = vmatpush3.bf16.msra.mxu1 %v3063_v35 }
 0x26c   :  { %2836 = vmatprep.subr.bf16.mxu1 %v3064_v36 }
 0x26e   :  { %2821 = vmatmul.mubr.msk.bf16.gmra.mrb[12].mxu1 %vm2455_vm3, %v3193_v43  ;;  %vm1831_vm3 = vcmp.eq.s32.totalorder %v3396_v37, %v1776_v39 }
 0x26f   :  { %2837 = vmatpush3.bf16.msra.mxu1 %v3064_v36  ;;  %2824 = vmatprep.mubr.msk.bf16.mxu1 %vm2457_vm4, %v3193_v43  ;;  %vm1834_vm4 = vcmp.eq.s32.totalorder %v3396_v37, %v1788_v41  ;;  %vm2487_vm5 = vmpackc.low %vm1832_vm1, %vm1831_vm3  ;;  %vm1839_vm1 = vcmp.eq.s32.totalorder %v3396_v37, %v1808_v53  ;;  %vm1842_vm3 = vcmp.eq.s32.totalorder %v3396_v37, %v1820_v54 }
 0x270   :  { %2838 = vmatprep.subr.bf16.mxu1 %v3065_v40  ;;  %vm2489_vm6 = vmpackc.low %vm1834_vm4, %vm1833_vm15  ;;  %vm1840_vm15 = vcmp.eq.s32.totalorder %v3396_v37, %v1812_v52  ;;  %vm1841_vm4 = vcmp.eq.s32.totalorder %v3396_v37, %v1816_v55 }
 0x273   :  { %2839 = vmatpush3.bf16.msra.mxu1 %v3065_v40 }
 0x274   :  { %2840 = vmatprep.subr.bf16.mxu1 %v3066_v44 }
 0x276   :  { %2825 = vmatmul.mubr.msk.bf16.gmra.mrb[16].mxu1 %vm2459_vm2, %v3193_v43  ;;  %vm1838_vm2 = vcmp.eq.s32.totalorder %v3396_v37, %v1804_v49 }
 0x277   :  { %2841 = vmatpush3.bf16.msra.mxu1 %v3066_v44  ;;  %2844 = vmatprep.mubr.msk.bf16.mxu1 %vm2485_vm0, %v3193_v43  ;;  %vm1837_vm0 = vcmp.eq.s32.totalorder %v3396_v37, %v1800_v50 }
 0x278   :  { %2842 = vmatprep.subr.bf16.mxu1 %v3067_v45  ;;  %vm2493_vm13 = vmpackc.low %vm1838_vm2, %vm1837_vm0 }
 0x27b   :  { %2843 = vmatpush3.bf16.msra.mxu1 %v3067_v45 }
 0x27e   :  { %2845 = vmatmul.mubr.msk.bf16.vlgmr.msra.gmra.mrb[4].mxu1 %vm2487_vm5, %v3193_v43  ;;  %vm2495_vm5 = vmpackc.low %vm1840_vm15, %vm1839_vm1 }
 0x27f   :  { %2848 = vmatprep.mubr.msk.bf16.mxu1 %vm2489_vm6, %v3193_v43  ;;  %vm2497_vm6 = vmpackc.low %vm1842_vm3, %vm1841_vm4 }
 0x286   :  { %2849 = vmatmul.mubr.msk.bf16.gmra.mrb[8].mxu1 %vm2491_vm14, %v3193_v43  ;;  %vm1844_vm14 = vcmp.eq.s32.totalorder %v3396_v37, %v1828_v56 }
 0x287   :  { %2852 = vmatprep.mubr.msk.bf16.mxu1 %vm2493_vm13, %v3193_v43  ;;  %vm1843_vm13 = vcmp.eq.s32.totalorder %v3396_v37, %v1824_v57 }
 0x288   :  { %vm2499_vm7 = vmpackc.low %vm1844_vm14, %vm1843_vm13 }
 0x28e   :  { %2853 = vmatmul.mubr.msk.bf16.gmra.mrb[12].mxu1 %vm2495_vm5, %v3193_v43 }
 0x28f   :  { %2856 = vmatprep.mubr.msk.bf16.mxu1 %vm2497_vm6, %v3193_v43 }
 0x296   :  { %2857 = vmatmul.mubr.msk.bf16.gmra.mrb[16].mxu1 %vm2499_vm7, %v3193_v43 }
 0x2f1   :  { %v1171_v59 = vpop.f32.mrb[0].mxu1 }
 0x2f2   :  { %v1172_v46 = vadd.f32 %v3677_v58, %v1171_v59  ;;  %v2763_v51 = vpop.f32.mrb[1].mxu1 }
 0x2f4   :  { %1176 = vst.msk [vmem:[%s3710_s6] sm:$0xff] %vm1175_vm8, %v1172_v46 }
 0x351   :  { %v2846_v60 = vpop.f32.mrb[4].mxu1 }
 0x352   :  { %v1983_v37 = vpop.f32.mrb[5].mxu1  ;;  %v2064_v63 = vmax.f32 %v2846_v60, 0.0 }
 0x353   :  { %v2847_v61 = vpop.f32.mrb[6].mxu1  ;;  %v2062_v1 = vmax.f32 %v1983_v37, 0.0 }
 0x354   :  { %v2065_v62 = vmax.f32 %v2847_v61, 0.0  ;;  %v1986_v43 = vpop.f32.mrb[7].mxu1 }
 0x355   :  { %v2063_v0 = vmax.f32 %v1986_v43, 0.0 }
 0x356   :  { %v2086_v2 = vsel %vm994_vm9, %v2065_v62, -inf }
 0x357   :  { %v2087_v3 = vmax.f32 %v2064_v63, %v2086_v2  ;;  %v2078_v5 = vsel %vm994_vm9, %v2063_v0, -inf }
 0x358   :  { %v2079_v6 = vmax.f32 %v2062_v1, %v2078_v5 }
 0x359   :  { %v2088_v7 = vrot.slane %v2087_v3, 4  ;;  %v2850_v9 = vpop.f32.mrb[8].mxu1 }
 0x35a   :  { %v2080_v10 = vrot.slane %v2079_v6, 4  ;;  %v1999_v11 = vpop.f32.mrb[9].mxu1  ;;  %v2068_v16 = vmax.f32 %v2850_v9, 0.0 }
 0x35b   :  { %v2089_v12 = vmax.f32 %v2087_v3, %v2088_v7  ;;  %v2851_v13 = vpop.f32.mrb[10].mxu1  ;;  %v2066_v19 = vmax.f32 %v1999_v11, 0.0 }
 0x35c   :  { %v2081_v4 = vmax.f32 %v2079_v6, %v2080_v10  ;;  %v2069_v8 = vmax.f32 %v2851_v13, 0.0  ;;  %v2002_v14 = vpop.f32.mrb[11].mxu1 }
 0x35d   :  { %v2090_v15 = vrot.slane %v2089_v12, 2  ;;  %v2067_v17 = vmax.f32 %v2002_v14, 0.0 }
 0x35e   :  { %v2082_v18 = vrot.slane %v2081_v4, 2  ;;  %v2102_v20 = vsel %vm994_vm9, %v2069_v8, -inf }
 0x35f   :  { %v2091_v21 = vmax.f32 %v2089_v12, %v2090_v15  ;;  %v2103_v22 = vmax.f32 %v2068_v16, %v2102_v20  ;;  %v2094_v23 = vsel %vm994_vm9, %v2067_v17, -inf }
 0x360   :  { %v2083_v24 = vmax.f32 %v2081_v4, %v2082_v18  ;;  %v2095_v25 = vmax.f32 %v2066_v19, %v2094_v23 }
 0x361   :  { %v2092_v26 = vrot.slane %v2091_v21, 1  ;;  %v2104_v27 = vrot.slane %v2103_v22, 4  ;;  %v2854_v28 = vpop.f32.mrb[12].mxu1 }
 0x362   :  { %v2084_v29 = vrot.slane %v2083_v24, 1  ;;  %v2096_v30 = vrot.slane %v2095_v25, 4  ;;  %v2015_v31 = vpop.f32.mrb[13].mxu1  ;;  %v2072_v41 = vmax.f32 %v2854_v28, 0.0 }
 0x363   :  { %v2093_v32 = vmax.f32 %v2091_v21, %v2092_v26  ;;  %v2105_v33 = vmax.f32 %v2103_v22, %v2104_v27  ;;  %v2855_v34 = vpop.f32.mrb[14].mxu1  ;;  %v2070_v47 = vmax.f32 %v2015_v31, 0.0 }
 0x364   :  { %v2085_v35 = vmax.f32 %v2083_v24, %v2084_v29  ;;  %v2097_v36 = vmax.f32 %v2095_v25, %v2096_v30  ;;  %v2073_v38 = vmax.f32 %v2855_v34, 0.0  ;;  %v2018_v39 = vpop.f32.mrb[15].mxu1 }
 0x365   :  { %v2106_v40 = vrot.slane %v2105_v33, 2  ;;  %v2071_v42 = vmax.f32 %v2018_v39, 0.0 }
 0x366   :  { %v2173_v44 = vsel %vm1090_vm10, %v2093_v32, %v2085_v35  ;;  %v2098_v45 = vrot.slane %v2097_v36, 2  ;;  %v2118_v48 = vsel %vm994_vm9, %v2073_v38, -inf  ;;  %vm3715_vm10 = vcmask 1044484  }
 0x367   :  { %v2107_v49 = vmax.f32 %v2105_v33, %v2106_v40  ;;  %v2119_v50 = vmax.f32 %v2072_v41, %v2118_v48  ;;  %v2110_v52 = vsel %vm994_vm9, %v2071_v42, -inf }
 0x368   :  { %v2099_v53 = vmax.f32 %v2097_v36, %v2098_v45  ;;  %v2111_v54 = vmax.f32 %v2070_v47, %v2110_v52 }
 0x369   :  { %v2108_v55 = vrot.slane %v2107_v49, 1  ;;  %v2120_v56 = vrot.slane %v2119_v50, 4  ;;  %v2858_v57 = vpop.f32.mrb[16].mxu1 }
 0x36a   :  { %v2100_v59 = vrot.slane %v2099_v53, 1  ;;  %v2112_v46 = vrot.slane %v2111_v54, 4  ;;  %v2031_v51 = vpop.f32.mrb[17].mxu1  ;;  %v2076_v2 = vmax.f32 %v2858_v57, 0.0 }
 0x36b   :  { %v2121_v60 = vmax.f32 %v2119_v50, %v2120_v56  ;;  %v2859_v37 = vpop.f32.mrb[18].mxu1  ;;  %v2109_v0 = vmax.f32 %v2107_v49, %v2108_v55  ;;  %v2074_v7 = vmax.f32 %v2031_v51, 0.0 }
 0x36c   :  { %v2101_v61 = vmax.f32 %v2099_v53, %v2100_v59  ;;  %v2113_v62 = vmax.f32 %v2111_v54, %v2112_v46  ;;  %v2077_v43 = vmax.f32 %v2859_v37, 0.0  ;;  %v2034_v63 = vpop.f32.mrb[19].mxu1 }
 0x36d   :  { %v2122_v1 = vrot.slane %v2121_v60, 2  ;;  %v2075_v3 = vmax.f32 %v2034_v63, 0.0 }
 0x36e   :  { %v2174_v5 = vsel %vm1092_vm11, %v2101_v61, %v2173_v44  ;;  %v2114_v6 = vrot.slane %v2113_v62, 2  ;;  %v2134_v9 = vsel %vm994_vm9, %v2077_v43, -inf  ;;  %vm3716_vm11 = vcmask 1045509  }
 0x36f   :  { %v2123_v10 = vmax.f32 %v2121_v60, %v2122_v1  ;;  %v2135_v11 = vmax.f32 %v2076_v2, %v2134_v9  ;;  %v2126_v12 = vsel %vm994_vm9, %v2075_v3, -inf  ;;  %v2175_v13 = vsel %vm1094_vm12, %v2109_v0, %v2174_v5 }
 0x370   :  { %v2115_v4 = vmax.f32 %v2113_v62, %v2114_v6  ;;  %v2127_v8 = vmax.f32 %v2074_v7, %v2126_v12  ;;  %vm3717_vm9 = vcmask 1046534   ;;  %vm3718_vm12 = vcmask 1047559  }
 0x371   :  { %v2124_v14 = vrot.slane %v2123_v10, 1  ;;  %v2136_v15 = vrot.slane %v2135_v11, 4 }
 0x372   :  { %v2116_v16 = vrot.slane %v2115_v4, 1  ;;  %v2128_v17 = vrot.slane %v2127_v8, 4 }
 0x373   :  { %v2137_v18 = vmax.f32 %v2135_v11, %v2136_v15  ;;  %v2125_v21 = vmax.f32 %v2123_v10, %v2124_v14 }
 0x374   :  { %v2117_v19 = vmax.f32 %v2115_v4, %v2116_v16  ;;  %v2129_v20 = vmax.f32 %v2127_v8, %v2128_v17 }
 0x375   :  { %v2138_v22 = vrot.slane %v2137_v18, 2 }
 0x376   :  { %v2130_v23 = vrot.slane %v2129_v20, 2  ;;  %v2176_v24 = vsel %vm3715_vm10, %v2117_v19, %v2175_v13 }
 0x377   :  { %v2139_v25 = vmax.f32 %v2137_v18, %v2138_v22  ;;  %v2177_v26 = vsel %vm3716_vm11, %v2125_v21, %v2176_v24 }
 0x378   :  { %v2131_v27 = vmax.f32 %v2129_v20, %v2130_v23 }
 0x379   :  { %v2140_v28 = vrot.slane %v2139_v25, 1 }
 0x37a   :  { %v2132_v29 = vrot.slane %v2131_v27, 1 }
 0x37b   :  { %v2141_v31 = vmax.f32 %v2139_v25, %v2140_v28 }
 0x37c   :  { %v2133_v30 = vmax.f32 %v2131_v27, %v2132_v29 }
 0x37e   :  { %v2178_v32 = vsel %vm3717_vm9, %v2133_v30, %v2177_v26 }
 0x37f   :  { %v2179_v33 = vsel %vm3718_vm12, %v2141_v31, %v2178_v32 }
 0x380   :  { %2893 = vmatmul.mubr.f32.vlgmr.msra.gmra.mrb[16].mxu0 %v2179_v33 }
 0x453   :  { %v2247_v34 = vpop.f32.mrb[16].mxu0 }
 0x454   :  { %v2248_v35 = vadd.f32 %v3677_v58, %v2247_v34  ;;  %v2894_v36 = vpop.f32.mrb[17].mxu0 }
 0x456   :  { %2502 = vst.msk [vmem:[%s3710_s6 + $0x8] sm:$0xff] %vm1175_vm8, %v2248_v35 }
 0x457   :  { %2257 = vsyncpa [#allocation3], 1 }
 0x458   :  { %2258 = vsyncpa [#allocation5], 1 }
 0x459   :  { %2259 = vsyncpa [#allocation8], 1 }

</bundles_post_ra>
